<compile_context>
chip_gen: v7x
topology: tpu7x:2x2x1
jax: 0.10.0
libtpu: 0.0.40
codegen_flags: <defaults>
</compile_context>

<pallas_src>
import numpy as np
import jax
import jax.numpy as jnp
from jax.experimental import pallas as pl
from jax.experimental.pallas import tpu as pltpu

_VMEM_LIMIT = 48 * 1024 * 1024   # safe for v5e/v6e (128 MiB) and v7x (64 MiB)


def _round_up(x, m):
    return (x + m - 1) // m * m


# ----------------------------------------------------------------------------
# Tiled matmul kernel: y = x @ w + b   (bf16 operands, f32 accumulation)
# ----------------------------------------------------------------------------
def _matmul_kernel(x_ref, w_ref, b_ref, o_ref, acc_ref):
    k = pl.program_id(2)

    @pl.when(k == 0)
    def _():
        acc_ref[...] = jnp.zeros_like(acc_ref)

    acc_ref[...] += jnp.dot(x_ref[...], w_ref[...],
                            preferred_element_type=jnp.float32)

    @pl.when(k == pl.num_programs(2) - 1)
    def _():
        o_ref[...] = (acc_ref[...] + b_ref[...]).astype(o_ref.dtype)


def pallas_matmul(x, w, b=None, *, tm=256, tn=256, tk=512,
                  out_dtype=jnp.float32, cast_bf16=True):
    """y = x @ w + b with a tiled, software-pipelined Pallas MXU kernel."""
    if cast_bf16:                      # cast BEFORE padding (one less HBM pass)
        x = x.astype(jnp.bfloat16)
        w = w.astype(jnp.bfloat16)
    M, K = x.shape
    K2, N = w.shape
    assert K == K2
    if b is None:
        b = jnp.zeros((N,), jnp.float32)
    b = jnp.asarray(b, jnp.float32).reshape(1, N)

    # Clamp tiles to (padded) array extents, pad only when not already aligned.
    Mp = _round_up(M, 8)
    Kp = _round_up(K, 128)
    Np = _round_up(N, 128)
    tm = min(tm, Mp)
    tk = min(tk, Kp)
    tn = min(tn, Np)
    Mp = _round_up(Mp, tm)
    Kp = _round_up(Kp, tk)
    Np = _round_up(Np, tn)

    xp = x if (Mp == M and Kp == K) else jnp.pad(x, ((0, Mp - M), (0, Kp - K)))
    wp = w if (Kp == K and Np == N) else jnp.pad(w, ((0, Kp - K), (0, Np - N)))
    bp = b if Np == N else jnp.pad(b, ((0, 0), (0, Np - N)))

    grid = (Mp // tm, Np // tn, Kp // tk)
    out = pl.pallas_call(
        _matmul_kernel,
        out_shape=jax.ShapeDtypeStruct((Mp, Np), out_dtype),
        grid=grid,
        in_specs=[
            pl.BlockSpec((tm, tk), lambda i, j, k: (i, k)),
            pl.BlockSpec((tk, tn), lambda i, j, k: (k, j)),
            pl.BlockSpec((1, tn), lambda i, j, k: (0, j)),
        ],
        out_specs=pl.BlockSpec((tm, tn), lambda i, j, k: (i, j)),
        scratch_shapes=[pltpu.VMEM((tm, tn), jnp.float32)],
        compiler_params=pltpu.CompilerParams(
            dimension_semantics=("parallel", "parallel", "arbitrary"),
            vmem_limit_bytes=_VMEM_LIMIT),
    )(xp, wp, bp)
    if (Mp, Np) != (M, N):
        out = out[:M, :N]
    return out


# ----------------------------------------------------------------------------
# Fused head: centered IFFT + (folded) 3x3 box prefilter, one kernel per batch.
#   prefilter(ifft2c(K)) == L @ K @ R,  L = (T/3)@Binv,  R = Binv@(T/3),
#   run as two PACKED real block matmuls (bf16 operands, f32 accumulation).
# ----------------------------------------------------------------------------
def _head_kernel(k_ref, rblk_ref, lblk_ref, o_ref, xh_ref, v_ref):
    N = o_ref.shape[-1]
    dot = lambda a, c: jnp.dot(a, c, preferred_element_type=jnp.float32)
    # horizontal complex stack  Xh = [Kr | Ki]   (bf16)
    xh_ref[:, :N] = k_ref[0, 0].astype(xh_ref.dtype)
    xh_ref[:, N:] = k_ref[0, 1].astype(xh_ref.dtype)
    # width transform:  [Tr | Ti] = Xh @ Rblk
    th = dot(xh_ref[...], rblk_ref[...])
    v_ref[:N, :] = th[:, :N].astype(v_ref.dtype)      # restack vertically
    v_ref[N:, :] = th[:, N:].astype(v_ref.dtype)
    # height transform: [Or ; Oi] = Lblk @ Tv
    ov = dot(lblk_ref[...], v_ref[...])
    o_ref[0, 0] = ov[:N, :].astype(o_ref.dtype)
    o_ref[0, 1] = ov[N:, :].astype(o_ref.dtype)


def fused_ifft_prefilter(kspace, Rblk, Lblk):
    B, _, N, _ = kspace.shape
    mat = pl.BlockSpec((2 * N, 2 * N), lambda b: (0, 0))
    return pl.pallas_call(
        _head_kernel,
        out_shape=jax.ShapeDtypeStruct((B, 2, N, N), jnp.bfloat16),
        grid=(B,),
        in_specs=[pl.BlockSpec((1, 2, N, N), lambda b: (b, 0, 0, 0)), mat, mat],
        out_specs=pl.BlockSpec((1, 2, N, N), lambda b: (b, 0, 0, 0)),
        scratch_shapes=[pltpu.VMEM((N, 2 * N), jnp.bfloat16),
                        pltpu.VMEM((2 * N, N), jnp.bfloat16)],
        compiler_params=pltpu.CompilerParams(
            dimension_semantics=("parallel",), vmem_limit_bytes=_VMEM_LIMIT),
    )(kspace, Rblk, Lblk)


# ----------------------------------------------------------------------------
# Fused tail: FFT -> data consistency -> IFFT -> complex_abs, one kernel/batch,
# DFT chains as packed real block matmuls (bf16 operands, f32 accumulation).
# ----------------------------------------------------------------------------
def _tail_kernel(x_ref, k_ref, m_ref, fR_ref, fL_ref, bR_ref, bL_ref, o_ref,
                 xh_ref, v_ref):
    N = o_ref.shape[-1]
    dot = lambda a, c: jnp.dot(a, c, preferred_element_type=jnp.float32)
    # ---- fft2c(net): width then height ----
    xh_ref[:, :N] = x_ref[0, 0].astype(xh_ref.dtype)
    xh_ref[:, N:] = x_ref[1, 0].astype(xh_ref.dtype)
    th = dot(xh_ref[...], fR_ref[...])
    v_ref[:N, :] = th[:, :N].astype(v_ref.dtype)
    v_ref[N:, :] = th[:, N:].astype(v_ref.dtype)
    kv = dot(fL_ref[...], v_ref[...])                    # (2N, N) = [Kr ; Ki]
    # ---- data consistency (column mask on the last k-space dim) ----
    m = m_ref[...]                                       # (1, N), broadcast over rows
    kr = m * k_ref[0, 0] + (1.0 - m) * kv[:N, :]
    ki = m * k_ref[0, 1] + (1.0 - m) * kv[N:, :]
    # ---- ifft2c ----
    xh_ref[:, :N] = kr.astype(xh_ref.dtype)
    xh_ref[:, N:] = ki.astype(xh_ref.dtype)
    uh = dot(xh_ref[...], bR_ref[...])
    v_ref[:N, :] = uh[:, :N].astype(v_ref.dtype)
    v_ref[N:, :] = uh[:, N:].astype(v_ref.dtype)
    iv = dot(bL_ref[...], v_ref[...])                    # (2N, N) = [Ir ; Ii]
    ir = iv[:N, :]
    ii = iv[N:, :]
    # ---- complex_abs ----
    o_ref[0] = jnp.sqrt(ir * ir + ii * ii)


def fused_tail(net_t, kspace, mask, FblkR, FblkL, BblkR, BblkL):
    _, B, N, _ = net_t.shape
    mat = pl.BlockSpec((2 * N, 2 * N), lambda b: (0, 0))
    return pl.pallas_call(
        _tail_kernel,
        out_shape=jax.ShapeDtypeStruct((B, N, N), jnp.float32),
        grid=(B,),
        in_specs=[
            pl.BlockSpec((2, 1, N, N), lambda b: (0, b, 0, 0)),   # net (channel-major)
            pl.BlockSpec((1, 2, N, N), lambda b: (b, 0, 0, 0)),   # kspace (f32)
            pl.BlockSpec((1, N), lambda b: (0, 0)),               # column mask
            mat, mat, mat, mat,
        ],
        out_specs=pl.BlockSpec((1, N, N), lambda b: (b, 0, 0)),
        scratch_shapes=[pltpu.VMEM((N, 2 * N), jnp.bfloat16),
                        pltpu.VMEM((2 * N, N), jnp.bfloat16)],
        compiler_params=pltpu.CompilerParams(
            dimension_semantics=("parallel",), vmem_limit_bytes=_VMEM_LIMIT),
    )(net_t, kspace, mask, FblkR, FblkL, BblkR, BblkL)


# ----------------------------------------------------------------------------
# im2col glue for the (small, 4x-overlap) embed conv only — stays in input dtype.
# ----------------------------------------------------------------------------
def im2col_rows(x, k, stride, pad):
    B, C, H, W = x.shape
    xp = jnp.pad(x, ((0, 0), (0, 0), (pad, pad), (pad, pad)))
    Ho = (H + 2 * pad - k) // stride + 1
    Wo = (W + 2 * pad - k) // stride + 1
    cols = []
    for i in range(k):
        for j in range(k):
            cols.append(xp[:, :, i:i + stride * (Ho - 1) + 1:stride,
                               j:j + stride * (Wo - 1) + 1:stride])
    patches = jnp.stack(cols, axis=2)                       # (B, C, k*k, Ho, Wo)
    rows = patches.transpose(0, 3, 4, 1, 2).reshape(B * Ho * Wo, C * k * k)
    return rows, Ho, Wo


# ----------------------------------------------------------------------------
# Parameters / constant matrices
# ----------------------------------------------------------------------------
def centered_dft_matrix(N, inverse):
    """Complex (N,N) matrix A with fft2c(X) == A @ X @ A (A symmetric, even N)."""
    assert N % 2 == 0, "centered DFT matrix symmetry requires even N"
    I = np.eye(N)
    X = np.fft.ifftshift(I, axes=0)
    Y = (np.fft.ifft(X, axis=0, norm="ortho") if inverse
         else np.fft.fft(X, axis=0, norm="ortho"))
    return np.fft.fftshift(Y, axes=0)


def _blk_right(A):     # [Xr | Xi] @ blk == [Re(X A) | Im(X A)]
    Ar, Ai = A.real, A.imag
    return np.block([[Ar, Ai], [-Ai, Ar]])


def _blk_left(A):      # blk @ [Tr ; Ti] == [Re(A T) ; Im(A T)]
    Ar, Ai = A.real, A.imag
    return np.block([[Ar, -Ai], [Ai, Ar]])


def init_params(N):
    dim, patch, stride = 128, 8, 4
    scale = stride
    key = jax.random.PRNGKey(42)
    k1, k2, k3, k4, k5, k6 = jax.random.split(key, 6)

    embed_w = 0.05 * jax.random.normal(k1, (dim, 2, patch, patch), jnp.float32)
    embed_b = 0.05 * jax.random.normal(k2, (dim,), jnp.float32)
    proj_w = 0.05 * jax.random.normal(k3, (dim * scale * scale, dim), jnp.float32)
    proj_b = 0.05 * jax.random.normal(k4, (dim * scale * scale,), jnp.float32)
    out_w = 0.05 * jax.random.normal(k5, (2, dim, 3, 3), jnp.float32)
    out_b = 0.05 * jax.random.normal(k6, (2,), jnp.float32)

    F = centered_dft_matrix(N, inverse=False)      # fft2c matrix
    Binv = centered_dft_matrix(N, inverse=True)    # ifft2c matrix
    # Fold the fixed 1/9 3x3 depthwise box prefilter (zero-padded) into the IFFT:
    T = np.eye(N) + np.eye(N, k=1) + np.eye(N, k=-1)
    L = (T @ Binv) / 3.0
    R = (Binv @ T) / 3.0

    bf16m = lambda a: jnp.asarray(np.ascontiguousarray(a), jnp.bfloat16)
    return {
        # conv weights packed for matmul, stored in bf16 (MXU operand dtype)
        "embed_w_mat": embed_w.reshape(dim, 2 * patch * patch).T.astype(jnp.bfloat16),
        "embed_b": embed_b,
        "proj_w_mat": proj_w.reshape(dim * scale * scale, dim).T.astype(jnp.bfloat16),
        "proj_b": proj_b,
        # 3x3 out-conv as 9 per-tap 1x1 convs: rows ordered (di, dj, co) -> (18, dim)
        "out_w_taps": out_w.transpose(2, 3, 0, 1).reshape(9 * 2, dim).astype(jnp.bfloat16),
        "out_b": out_b,
        # packed complex block matrices (real block-matmul form), bf16
        "head_R": bf16m(_blk_right(R)), "head_L": bf16m(_blk_left(L)),
        "FblkR": bf16m(_blk_right(F)), "FblkL": bf16m(_blk_left(F)),
        "BblkR": bf16m(_blk_right(Binv)), "BblkL": bf16m(_blk_left(Binv)),
    }


# ----------------------------------------------------------------------------
# RM1 forward
# ----------------------------------------------------------------------------
def rm1_forward(kspace_masked, col_mask, params):
    kspace = kspace_masked.astype(jnp.float32)
    B, C, H, W = kspace.shape
    assert C == 2 and H == W and H % 4 == 0
    N = H
    dim, patch, stride, padw = 128, 8, 4, 2
    r = stride

    # ---- IFFT + folded 3x3 box prefilter: one fused Pallas kernel per batch ----
    img = fused_ifft_prefilter(kspace, params["head_R"], params["head_L"])   # (B,2,N,N) bf16

    # ---- PatchEmbeddingOverlap.embed: Conv2d(2,128,8,s=4,p=2) via im2col + MXU ----
    patches, Ho, Wo = im2col_rows(img, k=patch, stride=stride, pad=padw)
    feat = pallas_matmul(patches, params["embed_w_mat"], params["embed_b"],
                         tm=512, out_dtype=jnp.bfloat16)                      # (B*Ho*Wo, dim)

    # TODO(synk): ConvMixerStack / UnConvMixerStack undefined in the reference -> identity.

    # ---- UnPatchEmbeddingPixelShuffle.proj: 1x1 conv == plain matmul ----
    proj = pallas_matmul(feat, params["proj_w_mat"], params["proj_b"],
                         tm=512, out_dtype=jnp.bfloat16)                      # (B*Ho*Wo, dim*16)

    # ---- PixelShuffle(4), emitted channel-major (pure layout glue) ----
    x_t = (proj.reshape(B, Ho, Wo, dim, r, r)
               .transpose(3, 0, 1, 4, 2, 5)
               .reshape(dim, B * N * N))                                      # (dim, B*N*N) bf16

    # ---- 3x3 out-conv: 9 per-tap 1x1 channel reductions in ONE lane-dense GEMM
    #      (K=dim=128, no padding), then a cheap 18-channel shift-and-add.     ----
    z = pallas_matmul(params["out_w_taps"], x_t, tn=1024)                     # (18, B*N*N) f32
    z = z.reshape(3, 3, 2, B, N, N)
    zp = jnp.pad(z, ((0, 0), (0, 0), (0, 0), (0, 0), (1, 1), (1, 1)))
    net = jnp.broadcast_to(params["out_b"].reshape(2, 1, 1, 1), (2, B, N, N))
    for di in range(3):
        for dj in range(3):
            net = net + zp[di, dj, :, :, di:di + N, dj:dj + N]
    net = net.astype(jnp.bfloat16)                                            # (2, B, N, N)

    # ---- FFT -> data consistency -> IFFT -> complex_abs, one fused kernel ----
    mask = col_mask.reshape(1, W).astype(jnp.float32)
    return fused_tail(net, kspace, mask, params["FblkR"], params["FblkL"],
                      params["BblkR"], params["BblkL"])                       # (B, N, N)


# ----------------------------------------------------------------------------
if __name__ == "__main__":
    B, C, H, W = 2, 2, 16, 16
    key = jax.random.PRNGKey(0)
    k_ks, k_m = jax.random.split(key)
    kspace_masked = jax.random.normal(k_ks, (B, C, H, W), jnp.float32)
    col_mask = jax.random.uniform(k_m, (W,)) > 0.5   # boolean column mask

    params = init_params(H)
    fwd = jax.jit(rm1_forward)
    out = jax.block_until_ready(fwd(kspace_masked, col_mask, params))

    assert out.shape == (B, H, W), out.shape
    assert bool(jnp.all(jnp.isfinite(out)))
    print("KERNEL_OK")
</pallas_src>

<mosaic_0001>
module attributes {stable_mosaic.version = 11 : i64} {
  func.func @_head_kernel(%arg0: i32, %arg1: memref<1x2x16x16xf32, #tpu.memory_space<vmem>>, %arg2: memref<32x32xbf16, #tpu.memory_space<vmem>>, %arg3: memref<32x32xbf16, #tpu.memory_space<vmem>>, %arg4: memref<1x2x16x16xbf16, #tpu.memory_space<vmem>>, %arg5: memref<16x32xbf16, #tpu.memory_space<vmem>>, %arg6: memref<32x16xbf16, #tpu.memory_space<vmem>>) attributes {dimension_semantics = [#tpu.dimension_semantics<parallel>], iteration_bounds = array<i64: 2>, scalar_prefetch = 0 : i64, scratch_operands = 2 : i64, tpu.core_type = #tpu.core_type<tc>, window_params = [{transform_indices = @transform_0, window_bounds = array<i64: 1, 2, 16, 16>}, {pipeline_mode = #tpu.pipeline_mode<synchronous>, transform_indices = @transform_1, window_bounds = array<i64: 32, 32>}, {pipeline_mode = #tpu.pipeline_mode<synchronous>, transform_indices = @transform_2, window_bounds = array<i64: 32, 32>}, {transform_indices = @transform_3, window_bounds = array<i64: 1, 2, 16, 16>}]} {
    %c0 = arith.constant 0 : index
    %c0_0 = arith.constant 0 : index
    %c0_1 = arith.constant 0 : index
    %c0_2 = arith.constant 0 : index
    %0 = vector.load %arg1[%c0, %c0_0, %c0_1, %c0_2] : memref<1x2x16x16xf32, #tpu.memory_space<vmem>>, vector<1x1x16x16xf32>
    %1 = vector.shape_cast %0 : vector<1x1x16x16xf32> to vector<16x16xf32>
    %2 = arith.truncf %1 : vector<16x16xf32> to vector<16x16xbf16>
    %c0_3 = arith.constant 0 : index
    %c0_4 = arith.constant 0 : index
    %3 = vector.load %arg5[%c0_3, %c0_4] : memref<16x32xbf16, #tpu.memory_space<vmem>>, vector<16x16xbf16>
    tpu.vector_store %arg5[%c0_3, %c0_4], %2 {strides = array<i32>} : memref<16x32xbf16, #tpu.memory_space<vmem>>, vector<16x16xbf16>,
    %c0_5 = arith.constant 0 : index
    %c1 = arith.constant 1 : index
    %c0_6 = arith.constant 0 : index
    %c0_7 = arith.constant 0 : index
    %4 = vector.load %arg1[%c0_5, %c1, %c0_6, %c0_7] : memref<1x2x16x16xf32, #tpu.memory_space<vmem>>, vector<1x1x16x16xf32>
    %5 = vector.shape_cast %4 : vector<1x1x16x16xf32> to vector<16x16xf32>
    %6 = arith.truncf %5 : vector<16x16xf32> to vector<16x16xbf16>
    %c0_8 = arith.constant 0 : index
    %c16 = arith.constant 16 : index
    %7 = vector.load %arg5[%c0_8, %c16] : memref<16x32xbf16, #tpu.memory_space<vmem>>, vector<16x16xbf16>
    tpu.vector_store %arg5[%c0_8, %c16], %6 {strides = array<i32>} : memref<16x32xbf16, #tpu.memory_space<vmem>>, vector<16x16xbf16>,
    %c0_9 = arith.constant 0 : index
    %c0_10 = arith.constant 0 : index
    %8 = vector.load %arg5[%c0_9, %c0_10] : memref<16x32xbf16, #tpu.memory_space<vmem>>, vector<16x32xbf16>
    %c0_11 = arith.constant 0 : index
    %c0_12 = arith.constant 0 : index
    %9 = vector.load %arg2[%c0_11, %c0_12] : memref<32x32xbf16, #tpu.memory_space<vmem>>, vector<32x32xbf16>
    %cst = arith.constant dense<0.000000e+00> : vector<16x32xf32>
    %10 = tpu.matmul %8, %9, %cst {dimension_numbers = #tpu.dot_dimension_numbers<[1], [0], [0], [1], [0, 0, 1, 1], [], []>} : vector<16x32xbf16>, vector<32x32xbf16>, vector<16x32xf32> -> vector<16x32xf32>
    %11 = vector.extract_strided_slice %10 {offsets = [0, 0], sizes = [16, 16], strides = [1, 1]} : vector<16x32xf32> to vector<16x16xf32>
    %12 = arith.truncf %11 : vector<16x16xf32> to vector<16x16xbf16>
    %c0_13 = arith.constant 0 : index
    %c0_14 = arith.constant 0 : index
    %13 = vector.load %arg6[%c0_13, %c0_14] : memref<32x16xbf16, #tpu.memory_space<vmem>>, vector<16x16xbf16>
    tpu.vector_store %arg6[%c0_13, %c0_14], %12 {strides = array<i32>} : memref<32x16xbf16, #tpu.memory_space<vmem>>, vector<16x16xbf16>,
    %14 = vector.extract_strided_slice %10 {offsets = [0, 16], sizes = [16, 16], strides = [1, 1]} : vector<16x32xf32> to vector<16x16xf32>
    %15 = arith.truncf %14 : vector<16x16xf32> to vector<16x16xbf16>
    %c16_15 = arith.constant 16 : index
    %c0_16 = arith.constant 0 : index
    %16 = vector.load %arg6[%c16_15, %c0_16] : memref<32x16xbf16, #tpu.memory_space<vmem>>, vector<16x16xbf16>
    tpu.vector_store %arg6[%c16_15, %c0_16], %15 {strides = array<i32>} : memref<32x16xbf16, #tpu.memory_space<vmem>>, vector<16x16xbf16>,
    %c0_17 = arith.constant 0 : index
    %c0_18 = arith.constant 0 : index
    %17 = vector.load %arg3[%c0_17, %c0_18] : memref<32x32xbf16, #tpu.memory_space<vmem>>, vector<32x32xbf16>
    %c0_19 = arith.constant 0 : index
    %c0_20 = arith.constant 0 : index
    %18 = vector.load %arg6[%c0_19, %c0_20] : memref<32x16xbf16, #tpu.memory_space<vmem>>, vector<32x16xbf16>
    %cst_21 = arith.constant dense<0.000000e+00> : vector<32x16xf32>
    %19 = tpu.matmul %17, %18, %cst_21 {dimension_numbers = #tpu.dot_dimension_numbers<[1], [0], [0], [1], [0, 0, 1, 1], [], []>} : vector<32x32xbf16>, vector<32x16xbf16>, vector<32x16xf32> -> vector<32x16xf32>
    %20 = vector.extract_strided_slice %19 {offsets = [0, 0], sizes = [16, 16], strides = [1, 1]} : vector<32x16xf32> to vector<16x16xf32>
    %21 = arith.truncf %20 : vector<16x16xf32> to vector<16x16xbf16>
    %c0_22 = arith.constant 0 : index
    %c0_23 = arith.constant 0 : index
    %c0_24 = arith.constant 0 : index
    %c0_25 = arith.constant 0 : index
    %22 = vector.load %arg4[%c0_22, %c0_23, %c0_24, %c0_25] : memref<1x2x16x16xbf16, #tpu.memory_space<vmem>>, vector<1x1x16x16xbf16>
    %23 = vector.shape_cast %22 : vector<1x1x16x16xbf16> to vector<16x16xbf16>
    %24 = vector.shape_cast %21 : vector<16x16xbf16> to vector<1x1x16x16xbf16>
    tpu.vector_store %arg4[%c0_22, %c0_23, %c0_24, %c0_25], %24 {strides = array<i32>} : memref<1x2x16x16xbf16, #tpu.memory_space<vmem>>, vector<1x1x16x16xbf16>,
    %25 = vector.extract_strided_slice %19 {offsets = [16, 0], sizes = [16, 16], strides = [1, 1]} : vector<32x16xf32> to vector<16x16xf32>
    %26 = arith.truncf %25 : vector<16x16xf32> to vector<16x16xbf16>
    %c0_26 = arith.constant 0 : index
    %c1_27 = arith.constant 1 : index
    %c0_28 = arith.constant 0 : index
    %c0_29 = arith.constant 0 : index
    %27 = vector.load %arg4[%c0_26, %c1_27, %c0_28, %c0_29] : memref<1x2x16x16xbf16, #tpu.memory_space<vmem>>, vector<1x1x16x16xbf16>
    %28 = vector.shape_cast %27 : vector<1x1x16x16xbf16> to vector<16x16xbf16>
    %29 = vector.shape_cast %26 : vector<16x16xbf16> to vector<1x1x16x16xbf16>
    tpu.vector_store %arg4[%c0_26, %c1_27, %c0_28, %c0_29], %29 {strides = array<i32>} : memref<1x2x16x16xbf16, #tpu.memory_space<vmem>>, vector<1x1x16x16xbf16>,
    return
  }
  func.func @transform_0(%arg0: i32) -> (i32, i32, i32, i32) {
    %c0_i32 = arith.constant 0 : i32
    %c0_i32_0 = arith.constant 0 : i32
    %c0_i32_1 = arith.constant 0 : i32
    %c0_i32_2 = arith.constant 0 : i32
    return %arg0, %c0_i32, %c0_i32_0, %c0_i32_1 : i32, i32, i32, i32
  }
  func.func @transform_1(%arg0: i32) -> (i32, i32) {
    %c0_i32 = arith.constant 0 : i32
    %c0_i32_0 = arith.constant 0 : i32
    %c0_i32_1 = arith.constant 0 : i32
    return %c0_i32, %c0_i32_0 : i32, i32
  }
  func.func @transform_2(%arg0: i32) -> (i32, i32) {
    %c0_i32 = arith.constant 0 : i32
    %c0_i32_0 = arith.constant 0 : i32
    %c0_i32_1 = arith.constant 0 : i32
    return %c0_i32, %c0_i32_0 : i32, i32
  }
  func.func @transform_3(%arg0: i32) -> (i32, i32, i32, i32) {
    %c0_i32 = arith.constant 0 : i32
    %c0_i32_0 = arith.constant 0 : i32
    %c0_i32_1 = arith.constant 0 : i32
    %c0_i32_2 = arith.constant 0 : i32
    return %arg0, %c0_i32, %c0_i32_0, %c0_i32_1 : i32, i32, i32, i32
  }
}

module attributes {stable_mosaic.version = 11 : i64} {
  func.func @_matmul_kernel(%arg0: i32, %arg1: i32, %arg2: i32, %arg3: memref<32x128xbf16, #tpu.memory_space<vmem>>, %arg4: memref<128x128xbf16, #tpu.memory_space<vmem>>, %arg5: memref<1x128xf32, #tpu.memory_space<vmem>>, %arg6: memref<32x128xbf16, #tpu.memory_space<vmem>>, %arg7: memref<32x128xf32, #tpu.memory_space<vmem>>) attributes {dimension_semantics = [#tpu.dimension_semantics<parallel>, #tpu.dimension_semantics<parallel>, #tpu.dimension_semantics<arbitrary>], iteration_bounds = array<i64: 1, 1, 1>, scalar_prefetch = 0 : i64, scratch_operands = 1 : i64, tpu.core_type = #tpu.core_type<tc>, window_params = [{transform_indices = @transform_0, window_bounds = array<i64: 32, 128>}, {transform_indices = @transform_1, window_bounds = array<i64: 128, 128>}, {transform_indices = @transform_2, window_bounds = array<i64: 1, 128>}, {transform_indices = @transform_3, window_bounds = array<i64: 32, 128>}]} {
    %c0_i32 = arith.constant 0 : i32
    %0 = arith.cmpi eq, %arg2, %c0_i32 : i32
    %1 = arith.extui %0 : i1 to i32
    %c0_i32_0 = arith.constant 0 : i32
    %2 = arith.cmpi ne, %1, %c0_i32_0 : i32
    scf.if %2 {
      %cst_10 = arith.constant 0.000000e+00 : f32
      %12 = vector.broadcast %cst_10 : f32 to vector<32x128xf32>
      %c0_11 = arith.constant 0 : index
      %c0_12 = arith.constant 0 : index
      %13 = vector.load %arg7[%c0_11, %c0_12] : memref<32x128xf32, #tpu.memory_space<vmem>>, vector<32x128xf32>
      tpu.vector_store %arg7[%c0_11, %c0_12], %12 {strides = array<i32>} : memref<32x128xf32, #tpu.memory_space<vmem>>, vector<32x128xf32>,
    } else {
    }
    %c0 = arith.constant 0 : index
    %c0_1 = arith.constant 0 : index
    %3 = vector.load %arg7[%c0, %c0_1] : memref<32x128xf32, #tpu.memory_space<vmem>>, vector<32x128xf32>
    %c0_2 = arith.constant 0 : index
    %c0_3 = arith.constant 0 : index
    %4 = vector.load %arg3[%c0_2, %c0_3] : memref<32x128xbf16, #tpu.memory_space<vmem>>, vector<32x128xbf16>
    %c0_4 = arith.constant 0 : index
    %c0_5 = arith.constant 0 : index
    %5 = vector.load %arg4[%c0_4, %c0_5] : memref<128x128xbf16, #tpu.memory_space<vmem>>, vector<128x128xbf16>
    %cst = arith.constant dense<0.000000e+00> : vector<32x128xf32>
    %6 = tpu.matmul %4, %5, %cst {dimension_numbers = #tpu.dot_dimension_numbers<[1], [0], [0], [1], [0, 0, 1, 1], [], []>} : vector<32x128xbf16>, vector<128x128xbf16>, vector<32x128xf32> -> vector<32x128xf32>
    %7 = arith.addf %3, %6 : vector<32x128xf32>
    %c0_6 = arith.constant 0 : index
    %c0_7 = arith.constant 0 : index
    %8 = vector.load %arg7[%c0_6, %c0_7] : memref<32x128xf32, #tpu.memory_space<vmem>>, vector<32x128xf32>
    tpu.vector_store %arg7[%c0_6, %c0_7], %7 {strides = array<i32>} : memref<32x128xf32, #tpu.memory_space<vmem>>, vector<32x128xf32>,
    %c0_i32_8 = arith.constant 0 : i32
    %9 = arith.cmpi eq, %arg2, %c0_i32_8 : i32
    %10 = arith.extui %9 : i1 to i32
    %c0_i32_9 = arith.constant 0 : i32
    %11 = arith.cmpi ne, %10, %c0_i32_9 : i32
    scf.if %11 {
      %c0_10 = arith.constant 0 : index
      %c0_11 = arith.constant 0 : index
      %12 = vector.load %arg7[%c0_10, %c0_11] : memref<32x128xf32, #tpu.memory_space<vmem>>, vector<32x128xf32>
      %c0_12 = arith.constant 0 : index
      %c0_13 = arith.constant 0 : index
      %13 = vector.load %arg5[%c0_12, %c0_13] : memref<1x128xf32, #tpu.memory_space<vmem>>, vector<1x128xf32>
      %14 = vector.broadcast %13 : vector<1x128xf32> to vector<32x128xf32>
      %15 = arith.addf %12, %14 : vector<32x128xf32>
      %16 = arith.truncf %15 : vector<32x128xf32> to vector<32x128xbf16>
      %c0_14 = arith.constant 0 : index
      %c0_15 = arith.constant 0 : index
      %17 = vector.load %arg6[%c0_14, %c0_15] : memref<32x128xbf16, #tpu.memory_space<vmem>>, vector<32x128xbf16>
      tpu.vector_store %arg6[%c0_14, %c0_15], %16 {strides = array<i32>} : memref<32x128xbf16, #tpu.memory_space<vmem>>, vector<32x128xbf16>,
    } else {
    }
    return
  }
  func.func @transform_0(%arg0: i32, %arg1: i32, %arg2: i32) -> (i32, i32) {
    %c0_i32 = arith.constant 0 : i32
    return %arg0, %arg2 : i32, i32
  }
  func.func @transform_1(%arg0: i32, %arg1: i32, %arg2: i32) -> (i32, i32) {
    %c0_i32 = arith.constant 0 : i32
    return %arg2, %arg1 : i32, i32
  }
  func.func @transform_2(%arg0: i32, %arg1: i32, %arg2: i32) -> (i32, i32) {
    %c0_i32 = arith.constant 0 : i32
    %c0_i32_0 = arith.constant 0 : i32
    return %c0_i32, %arg1 : i32, i32
  }
  func.func @transform_3(%arg0: i32, %arg1: i32, %arg2: i32) -> (i32, i32) {
    %c0_i32 = arith.constant 0 : i32
    return %arg0, %arg1 : i32, i32
  }
}

module attributes {stable_mosaic.version = 11 : i64} {
  func.func @_matmul_kernel(%arg0: i32, %arg1: i32, %arg2: i32, %arg3: memref<32x128xbf16, #tpu.memory_space<vmem>>, %arg4: memref<128x256xbf16, #tpu.memory_space<vmem>>, %arg5: memref<1x256xf32, #tpu.memory_space<vmem>>, %arg6: memref<32x256xbf16, #tpu.memory_space<vmem>>, %arg7: memref<32x256xf32, #tpu.memory_space<vmem>>) attributes {dimension_semantics = [#tpu.dimension_semantics<parallel>, #tpu.dimension_semantics<parallel>, #tpu.dimension_semantics<arbitrary>], iteration_bounds = array<i64: 1, 8, 1>, scalar_prefetch = 0 : i64, scratch_operands = 1 : i64, tpu.core_type = #tpu.core_type<tc>, window_params = [{transform_indices = @transform_0, window_bounds = array<i64: 32, 128>}, {transform_indices = @transform_1, window_bounds = array<i64: 128, 256>}, {transform_indices = @transform_2, window_bounds = array<i64: 1, 256>}, {transform_indices = @transform_3, window_bounds = array<i64: 32, 256>}]} {
    %c0_i32 = arith.constant 0 : i32
    %0 = arith.cmpi eq, %arg2, %c0_i32 : i32
    %1 = arith.extui %0 : i1 to i32
    %c0_i32_0 = arith.constant 0 : i32
    %2 = arith.cmpi ne, %1, %c0_i32_0 : i32
    scf.if %2 {
      %cst_10 = arith.constant 0.000000e+00 : f32
      %12 = vector.broadcast %cst_10 : f32 to vector<32x256xf32>
      %c0_11 = arith.constant 0 : index
      %c0_12 = arith.constant 0 : index
      %13 = vector.load %arg7[%c0_11, %c0_12] : memref<32x256xf32, #tpu.memory_space<vmem>>, vector<32x256xf32>
      tpu.vector_store %arg7[%c0_11, %c0_12], %12 {strides = array<i32>} : memref<32x256xf32, #tpu.memory_space<vmem>>, vector<32x256xf32>,
    } else {
    }
    %c0 = arith.constant 0 : index
    %c0_1 = arith.constant 0 : index
    %3 = vector.load %arg7[%c0, %c0_1] : memref<32x256xf32, #tpu.memory_space<vmem>>, vector<32x256xf32>
    %c0_2 = arith.constant 0 : index
    %c0_3 = arith.constant 0 : index
    %4 = vector.load %arg3[%c0_2, %c0_3] : memref<32x128xbf16, #tpu.memory_space<vmem>>, vector<32x128xbf16>
    %c0_4 = arith.constant 0 : index
    %c0_5 = arith.constant 0 : index
    %5 = vector.load %arg4[%c0_4, %c0_5] : memref<128x256xbf16, #tpu.memory_space<vmem>>, vector<128x256xbf16>
    %cst = arith.constant dense<0.000000e+00> : vector<32x256xf32>
    %6 = tpu.matmul %4, %5, %cst {dimension_numbers = #tpu.dot_dimension_numbers<[1], [0], [0], [1], [0, 0, 1, 1], [], []>} : vector<32x128xbf16>, vector<128x256xbf16>, vector<32x256xf32> -> vector<32x256xf32>
    %7 = arith.addf %3, %6 : vector<32x256xf32>
    %c0_6 = arith.constant 0 : index
    %c0_7 = arith.constant 0 : index
    %8 = vector.load %arg7[%c0_6, %c0_7] : memref<32x256xf32, #tpu.memory_space<vmem>>, vector<32x256xf32>
    tpu.vector_store %arg7[%c0_6, %c0_7], %7 {strides = array<i32>} : memref<32x256xf32, #tpu.memory_space<vmem>>, vector<32x256xf32>,
    %c0_i32_8 = arith.constant 0 : i32
    %9 = arith.cmpi eq, %arg2, %c0_i32_8 : i32
    %10 = arith.extui %9 : i1 to i32
    %c0_i32_9 = arith.constant 0 : i32
    %11 = arith.cmpi ne, %10, %c0_i32_9 : i32
    scf.if %11 {
      %c0_10 = arith.constant 0 : index
      %c0_11 = arith.constant 0 : index
      %12 = vector.load %arg7[%c0_10, %c0_11] : memref<32x256xf32, #tpu.memory_space<vmem>>, vector<32x256xf32>
      %c0_12 = arith.constant 0 : index
      %c0_13 = arith.constant 0 : index
      %13 = vector.load %arg5[%c0_12, %c0_13] : memref<1x256xf32, #tpu.memory_space<vmem>>, vector<1x256xf32>
      %14 = vector.broadcast %13 : vector<1x256xf32> to vector<32x256xf32>
      %15 = arith.addf %12, %14 : vector<32x256xf32>
      %16 = arith.truncf %15 : vector<32x256xf32> to vector<32x256xbf16>
      %c0_14 = arith.constant 0 : index
      %c0_15 = arith.constant 0 : index
      %17 = vector.load %arg6[%c0_14, %c0_15] : memref<32x256xbf16, #tpu.memory_space<vmem>>, vector<32x256xbf16>
      tpu.vector_store %arg6[%c0_14, %c0_15], %16 {strides = array<i32>} : memref<32x256xbf16, #tpu.memory_space<vmem>>, vector<32x256xbf16>,
    } else {
    }
    return
  }
  func.func @transform_0(%arg0: i32, %arg1: i32, %arg2: i32) -> (i32, i32) {
    %c0_i32 = arith.constant 0 : i32
    return %arg0, %arg2 : i32, i32
  }
  func.func @transform_1(%arg0: i32, %arg1: i32, %arg2: i32) -> (i32, i32) {
    %c0_i32 = arith.constant 0 : i32
    return %arg2, %arg1 : i32, i32
  }
  func.func @transform_2(%arg0: i32, %arg1: i32, %arg2: i32) -> (i32, i32) {
    %c0_i32 = arith.constant 0 : i32
    %c0_i32_0 = arith.constant 0 : i32
    return %c0_i32, %arg1 : i32, i32
  }
  func.func @transform_3(%arg0: i32, %arg1: i32, %arg2: i32) -> (i32, i32) {
    %c0_i32 = arith.constant 0 : i32
    return %arg0, %arg1 : i32, i32
  }
}

module attributes {stable_mosaic.version = 11 : i64} {
  func.func @_matmul_kernel(%arg0: i32, %arg1: i32, %arg2: i32, %arg3: memref<24x128xbf16, #tpu.memory_space<vmem>>, %arg4: memref<128x512xbf16, #tpu.memory_space<vmem>>, %arg5: memref<1x512xf32, #tpu.memory_space<vmem>>, %arg6: memref<24x512xf32, #tpu.memory_space<vmem>>, %arg7: memref<24x512xf32, #tpu.memory_space<vmem>>) attributes {dimension_semantics = [#tpu.dimension_semantics<parallel>, #tpu.dimension_semantics<parallel>, #tpu.dimension_semantics<arbitrary>], iteration_bounds = array<i64: 1, 1, 1>, scalar_prefetch = 0 : i64, scratch_operands = 1 : i64, tpu.core_type = #tpu.core_type<tc>, window_params = [{transform_indices = @transform_0, window_bounds = array<i64: 24, 128>}, {transform_indices = @transform_1, window_bounds = array<i64: 128, 512>}, {transform_indices = @transform_2, window_bounds = array<i64: 1, 512>}, {transform_indices = @transform_3, window_bounds = array<i64: 24, 512>}]} {
    %c0_i32 = arith.constant 0 : i32
    %0 = arith.cmpi eq, %arg2, %c0_i32 : i32
    %1 = arith.extui %0 : i1 to i32
    %c0_i32_0 = arith.constant 0 : i32
    %2 = arith.cmpi ne, %1, %c0_i32_0 : i32
    scf.if %2 {
      %cst_10 = arith.constant 0.000000e+00 : f32
      %12 = vector.broadcast %cst_10 : f32 to vector<24x512xf32>
      %c0_11 = arith.constant 0 : index
      %c0_12 = arith.constant 0 : index
      %13 = vector.load %arg7[%c0_11, %c0_12] : memref<24x512xf32, #tpu.memory_space<vmem>>, vector<24x512xf32>
      tpu.vector_store %arg7[%c0_11, %c0_12], %12 {strides = array<i32>} : memref<24x512xf32, #tpu.memory_space<vmem>>, vector<24x512xf32>,
    } else {
    }
    %c0 = arith.constant 0 : index
    %c0_1 = arith.constant 0 : index
    %3 = vector.load %arg7[%c0, %c0_1] : memref<24x512xf32, #tpu.memory_space<vmem>>, vector<24x512xf32>
    %c0_2 = arith.constant 0 : index
    %c0_3 = arith.constant 0 : index
    %4 = vector.load %arg3[%c0_2, %c0_3] : memref<24x128xbf16, #tpu.memory_space<vmem>>, vector<24x128xbf16>
    %c0_4 = arith.constant 0 : index
    %c0_5 = arith.constant 0 : index
    %5 = vector.load %arg4[%c0_4, %c0_5] : memref<128x512xbf16, #tpu.memory_space<vmem>>, vector<128x512xbf16>
    %cst = arith.constant dense<0.000000e+00> : vector<24x512xf32>
    %6 = tpu.matmul %4, %5, %cst {dimension_numbers = #tpu.dot_dimension_numbers<[1], [0], [0], [1], [0, 0, 1, 1], [], []>} : vector<24x128xbf16>, vector<128x512xbf16>, vector<24x512xf32> -> vector<24x512xf32>
    %7 = arith.addf %3, %6 : vector<24x512xf32>
    %c0_6 = arith.constant 0 : index
    %c0_7 = arith.constant 0 : index
    %8 = vector.load %arg7[%c0_6, %c0_7] : memref<24x512xf32, #tpu.memory_space<vmem>>, vector<24x512xf32>
    tpu.vector_store %arg7[%c0_6, %c0_7], %7 {strides = array<i32>} : memref<24x512xf32, #tpu.memory_space<vmem>>, vector<24x512xf32>,
    %c0_i32_8 = arith.constant 0 : i32
    %9 = arith.cmpi eq, %arg2, %c0_i32_8 : i32
    %10 = arith.extui %9 : i1 to i32
    %c0_i32_9 = arith.constant 0 : i32
    %11 = arith.cmpi ne, %10, %c0_i32_9 : i32
    scf.if %11 {
      %c0_10 = arith.constant 0 : index
      %c0_11 = arith.constant 0 : index
      %12 = vector.load %arg7[%c0_10, %c0_11] : memref<24x512xf32, #tpu.memory_space<vmem>>, vector<24x512xf32>
      %c0_12 = arith.constant 0 : index
      %c0_13 = arith.constant 0 : index
      %13 = vector.load %arg5[%c0_12, %c0_13] : memref<1x512xf32, #tpu.memory_space<vmem>>, vector<1x512xf32>
      %14 = vector.broadcast %13 : vector<1x512xf32> to vector<24x512xf32>
      %15 = arith.addf %12, %14 : vector<24x512xf32>
      %c0_14 = arith.constant 0 : index
      %c0_15 = arith.constant 0 : index
      %16 = vector.load %arg6[%c0_14, %c0_15] : memref<24x512xf32, #tpu.memory_space<vmem>>, vector<24x512xf32>
      tpu.vector_store %arg6[%c0_14, %c0_15], %15 {strides = array<i32>} : memref<24x512xf32, #tpu.memory_space<vmem>>, vector<24x512xf32>,
    } else {
    }
    return
  }
  func.func @transform_0(%arg0: i32, %arg1: i32, %arg2: i32) -> (i32, i32) {
    %c0_i32 = arith.constant 0 : i32
    return %arg0, %arg2 : i32, i32
  }
  func.func @transform_1(%arg0: i32, %arg1: i32, %arg2: i32) -> (i32, i32) {
    %c0_i32 = arith.constant 0 : i32
    return %arg2, %arg1 : i32, i32
  }
  func.func @transform_2(%arg0: i32, %arg1: i32, %arg2: i32) -> (i32, i32) {
    %c0_i32 = arith.constant 0 : i32
    %c0_i32_0 = arith.constant 0 : i32
    return %c0_i32, %arg1 : i32, i32
  }
  func.func @transform_3(%arg0: i32, %arg1: i32, %arg2: i32) -> (i32, i32) {
    %c0_i32 = arith.constant 0 : i32
    return %arg0, %arg1 : i32, i32
  }
}

module attributes {stable_mosaic.version = 11 : i64} {
  func.func @_tail_kernel(%arg0: i32, %arg1: memref<2x1x16x16xbf16, #tpu.memory_space<vmem>>, %arg2: memref<1x2x16x16xf32, #tpu.memory_space<vmem>>, %arg3: memref<1x16xf32, #tpu.memory_space<vmem>>, %arg4: memref<32x32xbf16, #tpu.memory_space<vmem>>, %arg5: memref<32x32xbf16, #tpu.memory_space<vmem>>, %arg6: memref<32x32xbf16, #tpu.memory_space<vmem>>, %arg7: memref<32x32xbf16, #tpu.memory_space<vmem>>, %arg8: memref<1x16x16xf32, #tpu.memory_space<vmem>>, %arg9: memref<16x32xbf16, #tpu.memory_space<vmem>>, %arg10: memref<32x16xbf16, #tpu.memory_space<vmem>>) attributes {dimension_semantics = [#tpu.dimension_semantics<parallel>], iteration_bounds = array<i64: 2>, scalar_prefetch = 0 : i64, scratch_operands = 2 : i64, tpu.core_type = #tpu.core_type<tc>, window_params = [{transform_indices = @transform_0, window_bounds = array<i64: 2, 1, 16, 16>}, {transform_indices = @transform_1, window_bounds = array<i64: 1, 2, 16, 16>}, {pipeline_mode = #tpu.pipeline_mode<synchronous>, transform_indices = @transform_2, window_bounds = array<i64: 1, 16>}, {pipeline_mode = #tpu.pipeline_mode<synchronous>, transform_indices = @transform_3, window_bounds = array<i64: 32, 32>}, {pipeline_mode = #tpu.pipeline_mode<synchronous>, transform_indices = @transform_4, window_bounds = array<i64: 32, 32>}, {pipeline_mode = #tpu.pipeline_mode<synchronous>, transform_indices = @transform_5, window_bounds = array<i64: 32, 32>}, {pipeline_mode = #tpu.pipeline_mode<synchronous>, transform_indices = @transform_6, window_bounds = array<i64: 32, 32>}, {transform_indices = @transform_7, window_bounds = array<i64: 1, 16, 16>}]} {
    %c0 = arith.constant 0 : index
    %c0_0 = arith.constant 0 : index
    %c0_1 = arith.constant 0 : index
    %c0_2 = arith.constant 0 : index
    %0 = vector.load %arg1[%c0, %c0_0, %c0_1, %c0_2] : memref<2x1x16x16xbf16, #tpu.memory_space<vmem>>, vector<1x1x16x16xbf16>
    %1 = vector.shape_cast %0 : vector<1x1x16x16xbf16> to vector<16x16xbf16>
    %c0_3 = arith.constant 0 : index
    %c0_4 = arith.constant 0 : index
    %2 = vector.load %arg9[%c0_3, %c0_4] : memref<16x32xbf16, #tpu.memory_space<vmem>>, vector<16x16xbf16>
    tpu.vector_store %arg9[%c0_3, %c0_4], %1 {strides = array<i32>} : memref<16x32xbf16, #tpu.memory_space<vmem>>, vector<16x16xbf16>,
    %c1 = arith.constant 1 : index
    %c0_5 = arith.constant 0 : index
    %c0_6 = arith.constant 0 : index
    %c0_7 = arith.constant 0 : index
    %3 = vector.load %arg1[%c1, %c0_5, %c0_6, %c0_7] : memref<2x1x16x16xbf16, #tpu.memory_space<vmem>>, vector<1x1x16x16xbf16>
    %4 = vector.shape_cast %3 : vector<1x1x16x16xbf16> to vector<16x16xbf16>
    %c0_8 = arith.constant 0 : index
    %c16 = arith.constant 16 : index
    %5 = vector.load %arg9[%c0_8, %c16] : memref<16x32xbf16, #tpu.memory_space<vmem>>, vector<16x16xbf16>
    tpu.vector_store %arg9[%c0_8, %c16], %4 {strides = array<i32>} : memref<16x32xbf16, #tpu.memory_space<vmem>>, vector<16x16xbf16>,
    %c0_9 = arith.constant 0 : index
    %c0_10 = arith.constant 0 : index
    %6 = vector.load %arg9[%c0_9, %c0_10] : memref<16x32xbf16, #tpu.memory_space<vmem>>, vector<16x32xbf16>
    %c0_11 = arith.constant 0 : index
    %c0_12 = arith.constant 0 : index
    %7 = vector.load %arg4[%c0_11, %c0_12] : memref<32x32xbf16, #tpu.memory_space<vmem>>, vector<32x32xbf16>
    %cst = arith.constant dense<0.000000e+00> : vector<16x32xf32>
    %8 = tpu.matmul %6, %7, %cst {dimension_numbers = #tpu.dot_dimension_numbers<[1], [0], [0], [1], [0, 0, 1, 1], [], []>} : vector<16x32xbf16>, vector<32x32xbf16>, vector<16x32xf32> -> vector<16x32xf32>
    %9 = vector.extract_strided_slice %8 {offsets = [0, 0], sizes = [16, 16], strides = [1, 1]} : vector<16x32xf32> to vector<16x16xf32>
    %10 = arith.truncf %9 : vector<16x16xf32> to vector<16x16xbf16>
    %c0_13 = arith.constant 0 : index
    %c0_14 = arith.constant 0 : index
    %11 = vector.load %arg10[%c0_13, %c0_14] : memref<32x16xbf16, #tpu.memory_space<vmem>>, vector<16x16xbf16>
    tpu.vector_store %arg10[%c0_13, %c0_14], %10 {strides = array<i32>} : memref<32x16xbf16, #tpu.memory_space<vmem>>, vector<16x16xbf16>,
    %12 = vector.extract_strided_slice %8 {offsets = [0, 16], sizes = [16, 16], strides = [1, 1]} : vector<16x32xf32> to vector<16x16xf32>
    %13 = arith.truncf %12 : vector<16x16xf32> to vector<16x16xbf16>
    %c16_15 = arith.constant 16 : index
    %c0_16 = arith.constant 0 : index
    %14 = vector.load %arg10[%c16_15, %c0_16] : memref<32x16xbf16, #tpu.memory_space<vmem>>, vector<16x16xbf16>
    tpu.vector_store %arg10[%c16_15, %c0_16], %13 {strides = array<i32>} : memref<32x16xbf16, #tpu.memory_space<vmem>>, vector<16x16xbf16>,
    %c0_17 = arith.constant 0 : index
    %c0_18 = arith.constant 0 : index
    %15 = vector.load %arg5[%c0_17, %c0_18] : memref<32x32xbf16, #tpu.memory_space<vmem>>, vector<32x32xbf16>
    %c0_19 = arith.constant 0 : index
    %c0_20 = arith.constant 0 : index
    %16 = vector.load %arg10[%c0_19, %c0_20] : memref<32x16xbf16, #tpu.memory_space<vmem>>, vector<32x16xbf16>
    %cst_21 = arith.constant dense<0.000000e+00> : vector<32x16xf32>
    %17 = tpu.matmul %15, %16, %cst_21 {dimension_numbers = #tpu.dot_dimension_numbers<[1], [0], [0], [1], [0, 0, 1, 1], [], []>} : vector<32x32xbf16>, vector<32x16xbf16>, vector<32x16xf32> -> vector<32x16xf32>
    %c0_22 = arith.constant 0 : index
    %c0_23 = arith.constant 0 : index
    %18 = vector.load %arg3[%c0_22, %c0_23] : memref<1x16xf32, #tpu.memory_space<vmem>>, vector<1x16xf32>
    %c0_24 = arith.constant 0 : index
    %c0_25 = arith.constant 0 : index
    %c0_26 = arith.constant 0 : index
    %c0_27 = arith.constant 0 : index
    %19 = vector.load %arg2[%c0_24, %c0_25, %c0_26, %c0_27] : memref<1x2x16x16xf32, #tpu.memory_space<vmem>>, vector<1x1x16x16xf32>
    %20 = vector.shape_cast %19 : vector<1x1x16x16xf32> to vector<16x16xf32>
    %21 = vector.broadcast %18 : vector<1x16xf32> to vector<16x16xf32>
    %22 = arith.mulf %21, %20 : vector<16x16xf32>
    %cst_28 = arith.constant 1.000000e+00 : f32
    %23 = vector.broadcast %cst_28 : f32 to vector<1x16xf32>
    %24 = arith.subf %23, %18 : vector<1x16xf32>
    %25 = vector.extract_strided_slice %17 {offsets = [0, 0], sizes = [16, 16], strides = [1, 1]} : vector<32x16xf32> to vector<16x16xf32>
    %26 = vector.broadcast %24 : vector<1x16xf32> to vector<16x16xf32>
    %27 = arith.mulf %26, %25 : vector<16x16xf32>
    %28 = arith.addf %22, %27 : vector<16x16xf32>
    %c0_29 = arith.constant 0 : index
    %c1_30 = arith.constant 1 : index
    %c0_31 = arith.constant 0 : index
    %c0_32 = arith.constant 0 : index
    %29 = vector.load %arg2[%c0_29, %c1_30, %c0_31, %c0_32] : memref<1x2x16x16xf32, #tpu.memory_space<vmem>>, vector<1x1x16x16xf32>
    %30 = vector.shape_cast %29 : vector<1x1x16x16xf32> to vector<16x16xf32>
    %31 = vector.broadcast %18 : vector<1x16xf32> to vector<16x16xf32>
    %32 = arith.mulf %31, %30 : vector<16x16xf32>
    %cst_33 = arith.constant 1.000000e+00 : f32
    %33 = vector.broadcast %cst_33 : f32 to vector<1x16xf32>
    %34 = arith.subf %33, %18 : vector<1x16xf32>
    %35 = vector.extract_strided_slice %17 {offsets = [16, 0], sizes = [16, 16], strides = [1, 1]} : vector<32x16xf32> to vector<16x16xf32>
    %36 = vector.broadcast %34 : vector<1x16xf32> to vector<16x16xf32>
    %37 = arith.mulf %36, %35 : vector<16x16xf32>
    %38 = arith.addf %32, %37 : vector<16x16xf32>
    %39 = arith.truncf %28 : vector<16x16xf32> to vector<16x16xbf16>
    %c0_34 = arith.constant 0 : index
    %c0_35 = arith.constant 0 : index
    %40 = vector.load %arg9[%c0_34, %c0_35] : memref<16x32xbf16, #tpu.memory_space<vmem>>, vector<16x16xbf16>
    tpu.vector_store %arg9[%c0_34, %c0_35], %39 {strides = array<i32>} : memref<16x32xbf16, #tpu.memory_space<vmem>>, vector<16x16xbf16>,
    %41 = arith.truncf %38 : vector<16x16xf32> to vector<16x16xbf16>
    %c0_36 = arith.constant 0 : index
    %c16_37 = arith.constant 16 : index
    %42 = vector.load %arg9[%c0_36, %c16_37] : memref<16x32xbf16, #tpu.memory_space<vmem>>, vector<16x16xbf16>
    tpu.vector_store %arg9[%c0_36, %c16_37], %41 {strides = array<i32>} : memref<16x32xbf16, #tpu.memory_space<vmem>>, vector<16x16xbf16>,
    %c0_38 = arith.constant 0 : index
    %c0_39 = arith.constant 0 : index
    %43 = vector.load %arg9[%c0_38, %c0_39] : memref<16x32xbf16, #tpu.memory_space<vmem>>, vector<16x32xbf16>
    %c0_40 = arith.constant 0 : index
    %c0_41 = arith.constant 0 : index
    %44 = vector.load %arg6[%c0_40, %c0_41] : memref<32x32xbf16, #tpu.memory_space<vmem>>, vector<32x32xbf16>
    %cst_42 = arith.constant dense<0.000000e+00> : vector<16x32xf32>
    %45 = tpu.matmul %43, %44, %cst_42 {dimension_numbers = #tpu.dot_dimension_numbers<[1], [0], [0], [1], [0, 0, 1, 1], [], []>} : vector<16x32xbf16>, vector<32x32xbf16>, vector<16x32xf32> -> vector<16x32xf32>
    %46 = vector.extract_strided_slice %45 {offsets = [0, 0], sizes = [16, 16], strides = [1, 1]} : vector<16x32xf32> to vector<16x16xf32>
    %47 = arith.truncf %46 : vector<16x16xf32> to vector<16x16xbf16>
    %c0_43 = arith.constant 0 : index
    %c0_44 = arith.constant 0 : index
    %48 = vector.load %arg10[%c0_43, %c0_44] : memref<32x16xbf16, #tpu.memory_space<vmem>>, vector<16x16xbf16>
    tpu.vector_store %arg10[%c0_43, %c0_44], %47 {strides = array<i32>} : memref<32x16xbf16, #tpu.memory_space<vmem>>, vector<16x16xbf16>,
    %49 = vector.extract_strided_slice %45 {offsets = [0, 16], sizes = [16, 16], strides = [1, 1]} : vector<16x32xf32> to vector<16x16xf32>
    %50 = arith.truncf %49 : vector<16x16xf32> to vector<16x16xbf16>
    %c16_45 = arith.constant 16 : index
    %c0_46 = arith.constant 0 : index
    %51 = vector.load %arg10[%c16_45, %c0_46] : memref<32x16xbf16, #tpu.memory_space<vmem>>, vector<16x16xbf16>
    tpu.vector_store %arg10[%c16_45, %c0_46], %50 {strides = array<i32>} : memref<32x16xbf16, #tpu.memory_space<vmem>>, vector<16x16xbf16>,
    %c0_47 = arith.constant 0 : index
    %c0_48 = arith.constant 0 : index
    %52 = vector.load %arg7[%c0_47, %c0_48] : memref<32x32xbf16, #tpu.memory_space<vmem>>, vector<32x32xbf16>
    %c0_49 = arith.constant 0 : index
    %c0_50 = arith.constant 0 : index
    %53 = vector.load %arg10[%c0_49, %c0_50] : memref<32x16xbf16, #tpu.memory_space<vmem>>, vector<32x16xbf16>
    %cst_51 = arith.constant dense<0.000000e+00> : vector<32x16xf32>
    %54 = tpu.matmul %52, %53, %cst_51 {dimension_numbers = #tpu.dot_dimension_numbers<[1], [0], [0], [1], [0, 0, 1, 1], [], []>} : vector<32x32xbf16>, vector<32x16xbf16>, vector<32x16xf32> -> vector<32x16xf32>
    %55 = vector.extract_strided_slice %54 {offsets = [0, 0], sizes = [16, 16], strides = [1, 1]} : vector<32x16xf32> to vector<16x16xf32>
    %56 = vector.extract_strided_slice %54 {offsets = [16, 0], sizes = [16, 16], strides = [1, 1]} : vector<32x16xf32> to vector<16x16xf32>
    %57 = arith.mulf %55, %55 : vector<16x16xf32>
    %58 = arith.mulf %56, %56 : vector<16x16xf32>
    %59 = arith.addf %57, %58 : vector<16x16xf32>
    %60 = math.sqrt %59 : vector<16x16xf32>
    %c0_52 = arith.constant 0 : index
    %c0_53 = arith.constant 0 : index
    %c0_54 = arith.constant 0 : index
    %61 = vector.load %arg8[%c0_52, %c0_53, %c0_54] : memref<1x16x16xf32, #tpu.memory_space<vmem>>, vector<1x16x16xf32>
    %62 = vector.shape_cast %61 : vector<1x16x16xf32> to vector<16x16xf32>
    %63 = vector.shape_cast %60 : vector<16x16xf32> to vector<1x16x16xf32>
    tpu.vector_store %arg8[%c0_52, %c0_53, %c0_54], %63 {strides = array<i32>} : memref<1x16x16xf32, #tpu.memory_space<vmem>>, vector<1x16x16xf32>,
    return
  }
  func.func @transform_0(%arg0: i32) -> (i32, i32, i32, i32) {
    %c0_i32 = arith.constant 0 : i32
    %c0_i32_0 = arith.constant 0 : i32
    %c0_i32_1 = arith.constant 0 : i32
    %c0_i32_2 = arith.constant 0 : i32
    return %c0_i32, %arg0, %c0_i32_0, %c0_i32_1 : i32, i32, i32, i32
  }
  func.func @transform_1(%arg0: i32) -> (i32, i32, i32, i32) {
    %c0_i32 = arith.constant 0 : i32
    %c0_i32_0 = arith.constant 0 : i32
    %c0_i32_1 = arith.constant 0 : i32
    %c0_i32_2 = arith.constant 0 : i32
    return %arg0, %c0_i32, %c0_i32_0, %c0_i32_1 : i32, i32, i32, i32
  }
  func.func @transform_2(%arg0: i32) -> (i32, i32) {
    %c0_i32 = arith.constant 0 : i32
    %c0_i32_0 = arith.constant 0 : i32
    %c0_i32_1 = arith.constant 0 : i32
    return %c0_i32, %c0_i32_0 : i32, i32
  }
  func.func @transform_3(%arg0: i32) -> (i32, i32) {
    %c0_i32 = arith.constant 0 : i32
    %c0_i32_0 = arith.constant 0 : i32
    %c0_i32_1 = arith.constant 0 : i32
    return %c0_i32, %c0_i32_0 : i32, i32
  }
  func.func @transform_4(%arg0: i32) -> (i32, i32) {
    %c0_i32 = arith.constant 0 : i32
    %c0_i32_0 = arith.constant 0 : i32
    %c0_i32_1 = arith.constant 0 : i32
    return %c0_i32, %c0_i32_0 : i32, i32
  }
  func.func @transform_5(%arg0: i32) -> (i32, i32) {
    %c0_i32 = arith.constant 0 : i32
    %c0_i32_0 = arith.constant 0 : i32
    %c0_i32_1 = arith.constant 0 : i32
    return %c0_i32, %c0_i32_0 : i32, i32
  }
  func.func @transform_6(%arg0: i32) -> (i32, i32) {
    %c0_i32 = arith.constant 0 : i32
    %c0_i32_0 = arith.constant 0 : i32
    %c0_i32_1 = arith.constant 0 : i32
    return %c0_i32, %c0_i32_0 : i32, i32
  }
  func.func @transform_7(%arg0: i32) -> (i32, i32, i32) {
    %c0_i32 = arith.constant 0 : i32
    %c0_i32_0 = arith.constant 0 : i32
    %c0_i32_1 = arith.constant 0 : i32
    return %arg0, %c0_i32, %c0_i32_0 : i32, i32, i32
  }
}

</mosaic_0001>

<bundles_post_ra>
// kernel: rm1_forward.5
= control target key start
LH: loop header
LB: loop body
LE: loop exit
PB: predicated region body
PF: predicated region fallthrough
CT: control target
= control target key end

     0   :  { %8 = vsyncpa [#allocation5], 0  ;;  %s954_s0 = inlined_call_operand.hbm [shape: f32[2,2,16,16], index: 0, kind: input, shape index: {}]   ;;  %s955_s1 = inlined_call_operand.hbm [shape: bf16[32,32], index: 1, kind: input, shape index: {}]   ;;  %s956_s2 = inlined_call_operand.hbm [shape: bf16[32,32], index: 2, kind: input, shape index: {}]   ;;  %s957_s3 = inlined_call_operand.vmem [shape: bf16[2,2,16,16], index: 3, kind: output, shape index: {}]  }
   0x1   :  { %10 = vsyncpa [#allocation5 + $0x1], 0 }
   0x2   :  { %11 = vsyncpa [#allocation7], 0  ;;  %s773_s12 = smov 0   ;;  %s775_s13 = smov 0  }
   0x3   :  { %s777_s14 = smov 0   ;;  %s779_s15 = smov 0  }
   0x4 LB: > { %s792_s16 = sadd.s32 4294967295, %s740_s15   ;;  %p37_p0 = scmp.ne.s32.totalorder %s732_s13, %s728_s12  ;;  %s740_s15 = sphi %s779_s15, %s972_s15   ;;  %s736_s14 = sphi %s777_s14, %s971_s14   ;;  %s732_s13 = sphi %s775_s13, %s970_s13   ;;  %s728_s12 = sphi %s773_s12, %s969_s12  }
   0x5   : > { %p958_p1 = scmp.eq.s32.totalorder %s792_s16, 0  ;;  %p485_p2 = scmp.ge.s32.totalorder %s740_s15, 1 }
   0x6   : > { %p116_p3 = scmp.lt.s32.totalorder %s740_s15, 3  ;;  %s742_s19 = smov [#allocation6]  }
   0x7   : > { %p800_p4 = por %p958_p1, %p37_p0  ;;  %s128_s20 = sshll.u32 %s742_s19, 4  ;;  %s129_s20 = int_to_ptr.vmem [resolvable:$true] %s128_s20 }
   0x8   : > { %p804_p5 = pnand %p485_p2, %p116_p3  ;;  %s743_s22 = smov [#allocation8]  }
   0x9   : > { %s961_s17 = scalar_select %p800_p4, 1, 0 }
   0xa   : > { %s962_s18 = scalar_select %p804_p5, 1, 0 }
   0xb   : > { %p554_p6 = pneg %p804_p5  ;;  %s141_s23 = sshll.u32 %s743_s22, 4  ;;  %s816_s23 = int_to_ptr.vmem [resolvable:$true] %s141_s23 }
   0xc   : > { %s616_s26 = scalar_lea.hbm %s955_s1, 256 }
   0xd   : > { %p812_p7 = pnand %p554_p6, %p958_p1  ;;  %p617_p8 = scmp.ne.s32.totalorder %s955_s1, %s616_s26 }
   0xe   : > { %p623_p12 = scmp.lt.u32.totalorder %s616_s26, %s955_s1 }
   0xf   : > { %p618_p9 = pneg %p812_p7 }
  0x11   : > { %p619_p10 = pnand %p618_p9, %p617_p8 }
  0x13   : > { %p620_p11 = pneg %p619_p10 }
  0x15   : > { %p625_p13 = pnand %p623_p12, %p620_p11 }
  0x17   : > { %628 = shalt.err (!%p625_p13)
}
  0x18   : > { %s629_s4 = scalar_lea.vmem %s129_s20, 256  ;;  %p637_p6 = scmp.lt.s32.totalorder %s129_s20, %s129_s20 }
  0x19   : > { %p630_p0 = scmp.ne.s32.totalorder %s129_s20, %s629_s4  ;;  %p638_p1 = scmp.lt.s32.totalorder %s629_s4, %s629_s4 }
  0x1b   : > { %p632_p2 = pnand %p630_p0, %p618_p9  ;;  %p639_p4 = por %p638_p1, %p637_p6 }
  0x1d   : > { %p633_p3 = pneg %p632_p2 }
  0x1f   : > { %p640_p5 = pnand %p639_p4, %p633_p3 }
  0x21   : > { %643 = shalt.err (!%p640_p5)
}
  0x22   : > { %s744_s5 = smov 64   ;;  %s745_s6 = smov 4  }
  0x23   : > { %557 = dma.hbm_to_vmem [thread:$0]  (!%p812_p7), %s955_s1, 256, %s129_s20, [#allocation7], %s744_s5, %s744_s5, %s745_s6  }
  0x24   : > { %s644_s11 = scalar_lea.hbm %s956_s2, 256 }
  0x25   : > { %p645_p8 = scmp.ne.s32.totalorder %s956_s2, %s644_s11  ;;  %p651_p5 = scmp.lt.u32.totalorder %s644_s11, %s956_s2 }
  0x27   : > { %p647_p1 = pnand %p645_p8, %p618_p9 }
  0x29   : > { %p648_p4 = pneg %p647_p1 }
  0x2b   : > { %p653_p10 = pnand %p651_p5, %p648_p4 }
  0x2d   : > { %656 = shalt.err (!%p653_p10)
}
  0x2e   : > { %s657_s20 = scalar_lea.vmem %s816_s23, 256  ;;  %p665_p0 = scmp.lt.s32.totalorder %s816_s23, %s816_s23 }
  0x2f   : > { %p658_p11 = scmp.ne.s32.totalorder %s816_s23, %s657_s20  ;;  %p666_p2 = scmp.lt.s32.totalorder %s657_s20, %s657_s20 }
  0x31   : > { %p660_p12 = pnand %p658_p11, %p618_p9  ;;  %p667_p3 = por %p666_p2, %p665_p0 }
  0x33   : > { %p661_p13 = pneg %p660_p12 }
  0x35   : > { %p668_p6 = pnand %p667_p3, %p661_p13 }
  0x37   : > { %671 = shalt.err (!%p668_p6)
}
  0x38   : > { %560 = dma.hbm_to_vmem [thread:$0]  (!%p812_p7), %s956_s2, 256, %s816_s23, [#allocation7], %s744_s5, %s744_s5, %s745_s6  }
  0x39   : > { %s866_s27 = sadd.s32 1, %s740_s15   ;;  %s24_s28 = sadd.s32 1, %s736_s14 }
  0x3a   : > { %s21_s21 = ssub.s32 %s740_s15, %s866_s27  ;;  %p31_p9 = scmp.ne.s32.totalorder %s736_s14, %s732_s13 }
  0x3b   : > { %p22_p8 = scmp.eq.s32.totalorder %s21_s21, 0  ;;  %p32_p1 = scmp.eq.s32.totalorder %s740_s15, 0 }
  0x3c   : > { %p567_p4 = scmp.lt.s32.totalorder %s740_s15, 2  ;;  %s155_s29 = sand.u32 1, %s736_s14  }
  0x3d   : > { %s877_s30 = scalar_select %p22_p8, %s736_s14, %s24_s28  }
  0x3e   : > { %p33_p5 = por %p32_p1, %p31_p9  ;;  %s489_s4 = sshll.u32 %s155_s29, 5 }
  0x3f   : > { %s515_s7 = sshll.u32 %s740_s15, 9  ;;  %s159_s23 = scalar_lea.vmem [#allocation4], %s489_s4 }
  0x40   : > { %s883_s10 = scalar_lea.hbm %s954_s0, %s515_s7  ;;  %s166_s5 = sshll.u32 %s159_s23, 4  ;;  %s889_s5 = int_to_ptr.vmem [resolvable:$true] %s166_s5 }
  0x41   : > { %p885_p7 = pnand %p567_p4, %p33_p5  ;;  %s891_s15 = scalar_lea.sflag [#allocation5], %s155_s29 }
  0x42   : > { %s672_s11 = scalar_lea.hbm %s883_s10, 512  ;;  %s677_s22 = scalar_lea.hbm %s954_s0, 1024 }
  0x43   : > { %p673_p10 = scmp.ne.s32.totalorder %s883_s10, %s672_s11  ;;  %p674_p11 = pneg %p885_p7 }
  0x44   : > { %p678_p0 = scmp.lt.u32.totalorder %s883_s10, %s954_s0  ;;  %p679_p2 = scmp.lt.u32.totalorder %s677_s22, %s672_s11 }
  0x45   : > { %p675_p12 = pnand %p674_p11, %p673_p10  ;;  %p681_p6 = scmp.lt.u32.totalorder %s672_s11, %s883_s10 }
  0x46   : > { %p680_p3 = por %p679_p2, %p678_p0 }
  0x47   : > { %p676_p13 = pneg %p675_p12 }
  0x48   : > { %p682_p9 = por %p681_p6, %p680_p3 }
  0x4a   : > { %p683_p8 = pnand %p682_p9, %p676_p13 }
  0x4c   : > { %686 = shalt.err (!%p683_p8)
}
  0x4d   : > { %s687_s25 = scalar_lea.vmem %s889_s5, 512  ;;  %s746_s26 = smov [#allocation4]  }
  0x4e   : > { %p688_p1 = scmp.ne.s32.totalorder %s889_s5, %s687_s25  ;;  %s692_s28 = sshll.u32 %s746_s26, 4  ;;  %s693_s28 = int_to_ptr.vmem [resolvable:$false] %s692_s28 }
  0x4f   : > { %s694_s21 = scalar_lea.vmem %s693_s28, 1024  ;;  %p695_p10 = scmp.lt.s32.totalorder %s889_s5, %s693_s28 }
  0x50   : > { %p690_p4 = pnand %p688_p1, %p674_p11  ;;  %p696_p12 = scmp.lt.s32.totalorder %s694_s21, %s687_s25 }
  0x52   : > { %p691_p5 = pneg %p690_p4  ;;  %p697_p0 = por %p696_p12, %p695_p10 }
  0x54   : > { %p698_p2 = pnand %p697_p0, %p691_p5 }
  0x56   : > { %701 = shalt.err (!%p698_p2)
}
  0x57   : > { %s747_s29 = smov 128   ;;  %s748_s4 = smov 8  }
  0x58   : > { %564 = dma.hbm_to_vmem [thread:$0]  (!%p885_p7), %s883_s10, 512, %s889_s5, %s891_s15, %s747_s29, %s747_s29, %s748_s4  }
  0x59   : > { %p965_p11 = scmp.ne.s32.totalorder %s962_s18, 0 }
  0x5a   : > { %s180_s7 = sand.u32 (!%p965_p11), 1, %s732_s13   ;;  %p966_p13 = scmp.ne.s32.totalorder (!%p965_p11), %s961_s17, 0 }
  0x5b   : > { %178 = sbr.rel (%p965_p11) target bundleno = 789 (0x315), region = 32  ;;  %s493_s8 = sshll.u32 (!%p965_p11), %s180_s7, 5 }
  0x5c   : > { %s181_s9 = scalar_lea.sflag (!%p965_p11), [#allocation5], %s180_s7  ;;  %s184_s23 = scalar_lea.vmem (!%p965_p11), [#allocation4], %s493_s8 }
  0x62   : > { %719 = dma.done.wait (%p966_p13), %s181_s9, 512  }
  0x63   : > { %721 = vsyncadd (%p966_p13), %s181_s9, 4294966784  ;;  %p967_p3 = scmp.eq.s32.totalorder %s792_s16, 0 }
  0x65   : > { %723 = dma.done.wait (%p967_p3), [#allocation7], 512   ;;  %p968_p6 = pmov %p967_p3 }
  0x66   : > { %v749_v0 = vmov 0.0   ;;  %vm750_vm0 = vmmov 0   ;;  %v498_v1 = vld [vmem:[%s184_s23 + $0x10] sm:$0xff]  ;;  %v499_v2 = vld [vmem:[%s184_s23 + $0x18] sm:$0xff]  ;;  %v221_v3 = vld [vmem:[%s184_s23] sm:$0xff]  ;;  %vm224_vm1 = vcmask 130048  }
  0x67   : > { %725 = vsyncadd (%p968_p6), [#allocation7], 4294966784  ;;  %528 = vmatprep.subr.bf16.mxu0 %v749_v0  ;;  %532 = vmatprep.mubr.msk.bf16.mxu0 %vm750_vm0, %v749_v0  ;;  %v229_v4 = vpack.c.bf16 %v499_v2, %v498_v1  ;;  %v222_v5 = vld [vmem:[%s184_s23 + $0x8] sm:$0xff]  ;;  %v612_v7 = vld [vmem:[#allocation6] sm:$0xff]   ;;  %s751_s17 = smov 16   ;;  %vm234_vm2 = vcmask 261248  }
  0x68   : > { %v223_v6 = vpack.c.bf16 %v222_v5, %v221_v3  ;;  %529 = vmatpush3.bf16.msra.mxu0 %v612_v7  ;;  %v613_v8 = vld [vmem:[#allocation6 + $0x8] sm:$0xff]   ;;  %vm253_vm3 = vcmask 261120   ;;  %v614_v13 = vld [vmem:[#allocation8] sm:$0xff]   ;;  %s752_s18 = smov 112   ;;  %v615_v20 = vld [vmem:[#allocation8 + $0x8] sm:$0xff]   ;;  %p215_p7 = scmp.lt.s32.totalorder %s792_s16, 1 }
  0x69   : > { %231 = vrot.lane.b32.xlu0 %v229_v4, %s751_s17  ;;  %530 = vmatprep.subr.bf16.mxu0 %v749_v0  ;;  %vm384_vm4 = vcmask 125952  }
  0x6a   : > { %225 = vst.msk [vmem:[#allocation2] sm:$0xff] %vm224_vm1, %v223_v6  ;;  %540 = vmatprep.mubr.msk.bf16.mxu1 %vm253_vm3, %v614_v13  ;;  %s974_s16 = smov (!%p215_p7, %s792_s16), 1 }
  0x6b   : > { %s516_s10 = sshll.u32 %s974_s16, 4 }
  0x6c   : > { %531 = vmatpush3.bf16.msra.mxu0 %v613_v8  ;;  %s219_s15 = scalar_lea.vmem %s957_s3, %s516_s10 }
  0xdb   : > { %v232_v9 = vpop.permute.xlu0 %231 }
  0xdc   : > { %235 = vst.msk [vmem:[#allocation2] sm:$0xff] %vm234_vm2, %v232_v9 }
  0xe3   : > { %v236_v10 = vld [vmem:[#allocation2] sm:$0xff] }
  0xe4   : > { %533 = vmatmul.mubr.msk.bf16.vlgmr.msra.gmra.mrb[0].mxu0 %vm253_vm3, %v236_v10 }
 0x1b7   : > { %v291_v11 = vpop.f32.mrb[0].mxu0 }
 0x1b8   : > { %v534_v12 = vpop.f32.mrb[1].mxu0 }
 0x1b9   : > { %v294_v14 = vpop.f32.mrb[2].mxu0 }
 0x1ba   : > { %v298_v15 = vpack.c.bf16 %v294_v14, %v291_v11  ;;  %v535_v16 = vpop.f32.mrb[3].mxu0 }
 0x1bc   : > { %299 = vst.msk [vmem:[#allocation3] sm:$0xff] %vm224_vm1, %v298_v15  ;;  %301 = vrot.lane.b32.xlu0 %v298_v15, %s752_s18 }
 0x1c3   : > { %v309_v17 = vld [vmem:[#allocation3] sm:$0xff] }
 0x1c4   : > { %536 = vmatprep.subr.bf16.mxu1 %v309_v17 }
 0x1c5   : > { %537 = vmatpush3.bf16.msra.mxu1 %v309_v17 }
 0x22e   : > { %v302_v18 = vpop.permute.xlu0 %301 }
 0x22f   : > { %304 = vst.msk [vmem:[#allocation3 + $0x8] sm:$0xff] %vm224_vm1, %v302_v18 }
 0x236   : > { %v310_v19 = vld [vmem:[#allocation3 + $0x8] sm:$0xff] }
 0x237   : > { %538 = vmatprep.subr.bf16.mxu1 %v310_v19 }
 0x238   : > { %539 = vmatpush3.bf16.msra.mxu1 %v310_v19 }
 0x23b   : > { %541 = vmatmul.mubr.msk.bf16.vlgmr.msra.gmra.mrb[0].mxu1 %vm253_vm3, %v615_v20 }
 0x30e   : > { %v542_v21 = vpop.f32.mrb[0].mxu1 }
 0x30f   : > { %v519_v22 = vpack.c.bf16 %v542_v21, %v542_v21  ;;  %v361_v23 = vpop.f32.mrb[1].mxu1 }
 0x310   : > { %v517_v24 = vpack.c.bf16 %v361_v23, %v361_v23  ;;  %v543_v25 = vpop.f32.mrb[2].mxu1 }
 0x311   : > { %511 = vst.msk [vmem:[%s219_s15 + $0x8] sm:$0xf] %vm384_vm4, %v519_v22  ;;  %v520_v26 = vpack.c.bf16 %v543_v25, %v543_v25  ;;  %v364_v27 = vpop.f32.mrb[3].mxu1 }
 0x312   : > { %385 = vst.msk [vmem:[%s219_s15] sm:$0xf] %vm384_vm4, %v517_v24  ;;  %v518_v28 = vpack.c.bf16 %v364_v27, %v364_v27 }
 0x313   : > { %512 = vst.msk [vmem:[%s219_s15 + $0xc] sm:$0xf] %vm384_vm4, %v520_v26 }
 0x314   : > { %386 = vst.msk [vmem:[%s219_s15 + $0x4] sm:$0xf] %vm384_vm4, %v518_v28 }
 0x315 PF: > { %p14_p9 = scmp.ge.s32.totalorder %s866_s27, 4   ;;  %s969_s12 = smov %s732_s13 }
 0x316   : > { %s970_s13 = smov %s736_s14  ;;  %s971_s14 = smov %s877_s30 }
 0x317   : > { %s972_s15 = smov %s866_s27  ;;  %16 = sbr.rel (!%p14_p9) target bundleno = 4 (0x4), region = 82 }
 0x31e   :  { %419 = vsyncpa [#allocation5], 1 }
 0x31f   :  { %421 = vsyncpa [#allocation5 + $0x1], 1 }
 0x320   :  { %422 = vsyncpa [#allocation7], 1 }

// kernel: rm1_forward.6
= control target key start
LH: loop header
LB: loop body
LE: loop exit
PB: predicated region body
PF: predicated region fallthrough
CT: control target
= control target key end

     0   :  { %8 = vsyncpa [#allocation4], 0  ;;  %s416_s0 = inlined_call_operand.vmem [shape: bf16[32,128], index: 0, kind: input, shape index: {}]   ;;  %s417_s1 = inlined_call_operand.hbm [shape: bf16[128,128], index: 1, kind: input, shape index: {}]   ;;  %s418_s2 = inlined_call_operand.hbm [shape: f32[1,128], index: 2, kind: input, shape index: {}]   ;;  %s419_s3 = inlined_call_operand.vmem [shape: bf16[32,128], index: 3, kind: output, shape index: {}]  }
   0x1   :  { %9 = vsyncpa [#allocation6], 0  ;;  %s356_s12 = smov [#allocation3]   ;;  %s308_s16 = scalar_lea.hbm %s417_s1, 1024 }
   0x2   :  { %s17_s13 = sshll.u32 %s356_s12, 4  ;;  %p309_p0 = scmp.ne.s32.totalorder %s417_s1, %s308_s16  ;;  %s18_s13 = int_to_ptr.vmem [resolvable:$true] %s17_s13 }
   0x3   :  { %p312_p1 = scmp.lt.u32.totalorder %s308_s16, %s417_s1 }
   0x5   :  { %p314_p2 = pnand %p312_p1, %p309_p0 }
   0x7   :  { %317 = shalt.err (!%p314_p2)
}
   0x8   :  { %s318_s21 = scalar_lea.vmem %s18_s13, 1024  ;;  %p323_p4 = scmp.lt.s32.totalorder %s18_s13, %s18_s13 }
   0x9   :  { %p319_p3 = scmp.ne.s32.totalorder %s18_s13, %s318_s21  ;;  %p324_p5 = scmp.lt.s32.totalorder %s318_s21, %s318_s21 }
   0xb   :  { %p325_p6 = por %p324_p5, %p323_p4 }
   0xd   :  { %p326_p7 = pnand %p325_p6, %p319_p3 }
   0xf   :  { %329 = shalt.err (!%p326_p7)
}
  0x10   :  { %s357_s22 = smov 64   ;;  %s358_s23 = smov 4  }
  0x11   :  { %23 = dma.hbm_to_vmem [thread:$0]  %s417_s1, 1024, %s18_s13, [#allocation4], %s357_s22, %s357_s22, %s358_s23  }
  0x12   :  { %s359_s26 = smov [#allocation5]   ;;  %s330_s30 = scalar_lea.hbm %s418_s2, 16 }
  0x13   :  { %s30_s27 = sshll.u32 %s359_s26, 4  ;;  %p331_p8 = scmp.ne.s32.totalorder %s418_s2, %s330_s30  ;;  %s31_s27 = int_to_ptr.vmem [resolvable:$true] %s30_s27 }
  0x14   :  { %p334_p9 = scmp.lt.u32.totalorder %s330_s30, %s418_s2 }
  0x16   :  { %p336_p10 = pnand %p334_p9, %p331_p8 }
  0x18   :  { %339 = shalt.err (!%p336_p10)
}
  0x19   :  { %s340_s8 = scalar_lea.vmem %s31_s27, 16  ;;  %s344_s1 = scalar_lea.vmem %s31_s27, 32 }
  0x1a   :  { %p341_p11 = scmp.ne.s32.totalorder %s31_s27, %s340_s8  ;;  %p345_p12 = scmp.lt.s32.totalorder %s31_s27, %s31_s27 }
  0x1b   :  { %p346_p13 = scmp.lt.s32.totalorder %s344_s1, %s340_s8 }
  0x1d   :  { %p347_p0 = por %p346_p13, %p345_p12 }
  0x1f   :  { %p348_p1 = pnand %p347_p0, %p341_p11 }
  0x21   :  { %351 = shalt.err (!%p348_p1)
}
  0x22   :  { %33 = dma.hbm_to_vmem [thread:$0]  %s418_s2, 16, %s31_s27, [#allocation6]  }
  0x23   :  { %352 = dma.done.wait [#allocation4], 1024  }
  0x24   :  { %353 = vsyncadd [#allocation4], 4294966272 }
  0x25   :  { %354 = dma.done.wait [#allocation6], 16  }
  0x26   :  { %355 = vsyncadd [#allocation6], 4294967280  ;;  %v298_v0 = vld [vmem:[#allocation3] sm:$0xff]   ;;  %v299_v1 = vld [vmem:[#allocation3 + $0x8] sm:$0xff]  }
  0x27   :  { %274 = vmatprep.subr.bf16.mxu0 %v298_v0  ;;  %v300_v2 = vld [vmem:[#allocation3 + $0x10] sm:$0xff]   ;;  %v301_v3 = vld [vmem:[#allocation3 + $0x18] sm:$0xff]   ;;  %v306_v4 = vld [vmem:[%s416_s0] sm:$0xff]  }
  0x28   :  { %275 = vmatpush3.bf16.msra.mxu0 %v298_v0  ;;  %290 = vmatprep.mubr.bf16.mxu0 %v306_v4  ;;  %v302_v5 = vld [vmem:[#allocation3 + $0x20] sm:$0xff]   ;;  %v303_v6 = vld [vmem:[#allocation3 + $0x28] sm:$0xff]   ;;  %v304_v7 = vld [vmem:[#allocation3 + $0x30] sm:$0xff]  }
  0x29   :  { %276 = vmatprep.subr.bf16.mxu0 %v299_v1  ;;  %v305_v8 = vld [vmem:[#allocation3 + $0x38] sm:$0xff]   ;;  %v307_v9 = vld [vmem:[%s416_s0 + $0x8] sm:$0xff]   ;;  %v244_v11 = vld [vmem:[#allocation5] ss:$0 sm:$0xff] }
  0x2c   :  { %277 = vmatpush3.bf16.msra.mxu0 %v299_v1 }
  0x2d   :  { %278 = vmatprep.subr.bf16.mxu0 %v300_v2 }
  0x30   :  { %279 = vmatpush3.bf16.msra.mxu0 %v300_v2 }
  0x31   :  { %280 = vmatprep.subr.bf16.mxu0 %v301_v3 }
  0x34   :  { %281 = vmatpush3.bf16.msra.mxu0 %v301_v3 }
  0x35   :  { %282 = vmatprep.subr.bf16.mxu0 %v302_v5 }
  0x38   :  { %283 = vmatpush3.bf16.msra.mxu0 %v302_v5 }
  0x39   :  { %284 = vmatprep.subr.bf16.mxu0 %v303_v6 }
  0x3c   :  { %285 = vmatpush3.bf16.msra.mxu0 %v303_v6 }
  0x3d   :  { %286 = vmatprep.subr.bf16.mxu0 %v304_v7 }
  0x40   :  { %287 = vmatpush3.bf16.msra.mxu0 %v304_v7 }
  0x41   :  { %288 = vmatprep.subr.bf16.mxu0 %v305_v8 }
  0x44   :  { %289 = vmatpush3.bf16.msra.mxu0 %v305_v8 }
  0x47   :  { %291 = vmatmul.mubr.bf16.vlgmr.msra.gmra.mrb[0].mxu0 %v307_v9 }
 0x11a   :  { %v292_v10 = vpop.f32.mrb[0].mxu0 }
 0x11b   :  { %v167_v12 = vpop.f32.mrb[1].mxu0  ;;  %v206_v14 = vadd.f32 %v292_v10, %v244_v11 }
 0x11c   :  { %v293_v13 = vpop.f32.mrb[2].mxu0  ;;  %v204_v17 = vadd.f32 %v244_v11, %v167_v12 }
 0x11d   :  { %v207_v15 = vadd.f32 %v293_v13, %v244_v11  ;;  %v170_v16 = vpop.f32.mrb[3].mxu0 }
 0x11e   :  { %v205_v18 = vadd.f32 %v244_v11, %v170_v16 }
 0x11f   :  { %v261_v19 = vpack.c.bf16 %v207_v15, %v206_v14 }
 0x120   :  { %v256_v20 = vpack.c.bf16 %v205_v18, %v204_v17 }
 0x121   :  { %263 = vst [vmem:[%s419_s3 + $0x8] sm:$0xff] %v261_v19  }
 0x122   :  { %257 = vst [vmem:[%s419_s3] sm:$0xff] %v256_v20  }
 0x123   :  { %232 = vsyncpa [#allocation4], 1 }
 0x124   :  { %233 = vsyncpa [#allocation6], 1 }

// kernel: rm1_forward.7
= control target key start
LH: loop header
LB: loop body
LE: loop exit
PB: predicated region body
PF: predicated region fallthrough
CT: control target
= control target key end

     0   :  { %8 = vsyncpa [#allocation4], 0  ;;  %s1227_s0 = inlined_call_operand.vmem [shape: bf16[32,128], index: 0, kind: input, shape index: {}]   ;;  %s1228_s1 = inlined_call_operand.hbm [shape: bf16[128,2048], index: 1, kind: input, shape index: {}]   ;;  %s1229_s2 = inlined_call_operand.hbm [shape: f32[1,2048], index: 2, kind: input, shape index: {}]   ;;  %s1230_s3 = inlined_call_operand.vmem [shape: bf16[32,2048], index: 3, kind: output, shape index: {}]  }
   0x1   :  { %10 = vsyncpa [#allocation4 + $0x1], 0 }
   0x2   :  { %11 = vsyncpa [#allocation6], 0 }
   0x3   :  { %13 = vsyncpa [#allocation6 + $0x1], 0  ;;  %s1022_s12 = smov 0   ;;  %s1024_s13 = smov 0  }
   0x4   :  { %s1026_s14 = smov 0   ;;  %s1028_s15 = smov 0  }
   0x5   :  { %s1030_s16 = smov 0   ;;  %s1032_s17 = smov 0  }
   0x6 LB: > { %s725_s18 = sadd.s32 4294967295, %s994_s17   ;;  %s34_s19 = sadd.s32 1, %s990_s16  ;;  %s994_s17 = sphi %s1032_s17, %s19_s17   ;;  %s990_s16 = sphi %s1030_s16, %s1245_s16   ;;  %s986_s15 = sphi %s1028_s15, %s1244_s15   ;;  %s982_s14 = sphi %s1026_s14, %s1243_s14   ;;  %s978_s13 = sphi %s1024_s13, %s1242_s13   ;;  %s974_s12 = sphi %s1022_s12, %s1241_s12  }
   0x7   : > { %p36_p0 = scmp.ge.s32.totalorder %s34_s19, 8  ;;  %s75_s20 = sadd.s32 1, %s982_s14 }
   0x8   : > { %p82_p1 = scmp.ne.s32.totalorder %s982_s14, %s978_s13  ;;  %p83_p2 = scmp.eq.s32.totalorder %s994_s17, 0 }
   0x9   : > { %s1247_s19 = smov (%p36_p0, %s34_s19), 0  ;;  %p88_p4 = scmp.ne.s32.totalorder %s978_s13, %s974_s12 }
   0xa   : > { %p1058_p3 = por %p83_p2, %p82_p1  ;;  %s71_s22 = ssub.s32 %s990_s16, %s1247_s19 }
   0xb   : > { %p89_p5 = scmp.eq.s32.totalorder %s725_s18, 0  ;;  %p73_p6 = scmp.eq.s32.totalorder %s71_s22, 0 }
   0xc   : > { %p140_p7 = scmp.eq.s32.totalorder %s725_s18, 7  ;;  %p801_p10 = scmp.lt.s32.totalorder %s994_s17, 8 }
   0xd   : > { %p1065_p8 = por %p89_p5, %p88_p4  ;;  %s1078_s26 = sand.u32 1, %s982_s14  }
   0xe   : > { %s1070_s24 = scalar_select %p73_p6, %s982_s14, %s75_s20  }
   0xf   : > { %s1233_s23 = scalar_select %p1065_p8, 1, 0 }
  0x10   : > { %p1072_p9 = por %p140_p7, %p82_p1  ;;  %s767_s27 = sshll.u32 %s990_s16, 7 }
  0x11   : > { %s730_s28 = sshll.u32 %s1078_s26, 7  ;;  %s1085_s4 = scalar_lea.hbm %s1228_s1, %s767_s27 }
  0x12   : > { %s1234_s25 = scalar_select %p1072_p9, 1, 0 }
  0x13   : > { %s182_s5 = scalar_lea.vmem [#allocation3], %s730_s28  ;;  %p1089_p11 = pnand %p801_p10, %p1058_p3 }
  0x14   : > { %s192_s6 = sshll.u32 %s182_s5, 4  ;;  %s179_s8 = scalar_lea.sflag [#allocation4], %s1078_s26  ;;  %s1093_s6 = int_to_ptr.vmem [resolvable:$true] %s192_s6 }
  0x15   : > { %s880_s9 = scalar_lea.hbm %s1085_s4, 2048  ;;  %p882_p0 = pneg %p1089_p11 }
  0x16   : > { %p881_p13 = scmp.ne.s32.totalorder %s1085_s4, %s880_s9  ;;  %s885_s12 = scalar_lea.hbm %s1228_s1, 16384 }
  0x17   : > { %p886_p3 = scmp.lt.u32.totalorder %s1085_s4, %s1228_s1  ;;  %p887_p4 = scmp.lt.u32.totalorder %s885_s12, %s880_s9 }
  0x18   : > { %p883_p1 = pnand %p882_p0, %p881_p13  ;;  %p889_p6 = scmp.lt.u32.totalorder %s880_s9, %s1085_s4 }
  0x19   : > { %p888_p5 = por %p887_p4, %p886_p3 }
  0x1a   : > { %p884_p2 = pneg %p883_p1 }
  0x1b   : > { %p890_p7 = por %p889_p6, %p888_p5 }
  0x1d   : > { %p891_p10 = pnand %p890_p7, %p884_p2 }
  0x1f   : > { %894 = shalt.err (!%p891_p10)
}
  0x20   : > { %s895_s21 = scalar_lea.vmem %s1093_s6, 2048  ;;  %s996_s22 = smov [#allocation3]  }
  0x21   : > { %p896_p13 = scmp.ne.s32.totalorder %s1093_s6, %s895_s21  ;;  %s900_s27 = sshll.u32 %s996_s22, 4  ;;  %s901_s27 = int_to_ptr.vmem [resolvable:$false] %s900_s27 }
  0x22   : > { %s902_s28 = scalar_lea.vmem %s901_s27, 4096  ;;  %p903_p9 = scmp.lt.s32.totalorder %s1093_s6, %s901_s27 }
  0x23   : > { %p898_p1 = pnand %p896_p13, %p882_p0  ;;  %p904_p3 = scmp.lt.s32.totalorder %s902_s28, %s895_s21 }
  0x25   : > { %p899_p12 = pneg %p898_p1  ;;  %p905_p4 = por %p904_p3, %p903_p9 }
  0x27   : > { %p906_p5 = pnand %p905_p4, %p899_p12 }
  0x29   : > { %909 = shalt.err (!%p906_p5)
}
  0x2a   : > { %s997_s29 = smov 1024   ;;  %s998_s30 = smov 128  }
  0x2b   : > { %s999_s5 = smov 8   ;;  %p219_p2 = scmp.lt.s32.totalorder %s994_s17, 9 }
  0x2c   : > { %797 = dma.hbm_to_vmem [thread:$0]  (!%p1089_p11), %s1085_s4, 2048, %s1093_s6, %s179_s8, %s997_s29, %s998_s30, %s999_s5  }
  0x2d   : > { %s733_s9 = sshll.u32 %s1078_s26, 1  ;;  %s768_s10 = sshll.u32 %s990_s16, 5 }
  0x2e   : > { %p1236_p9 = scmp.ge.s32.totalorder %s994_s17, 1  ;;  %s1136_s20 = scalar_lea.hbm %s1229_s2, %s768_s10 }
  0x2f   : > { %s206_s21 = scalar_lea.vmem [#allocation5], %s733_s9  ;;  %s203_s4 = scalar_lea.sflag [#allocation6], %s1078_s26 }
  0x30   : > { %p1129_p12 = pnand %p1236_p9, %p219_p2  ;;  %s214_s22 = sshll.u32 %s206_s21, 4  ;;  %s215_s22 = int_to_ptr.vmem [resolvable:$true] %s214_s22 }
  0x31   : > { %s910_s6 = scalar_lea.hbm %s1136_s20, 32  ;;  %s915_s28 = scalar_lea.hbm %s1229_s2, 256 }
  0x32   : > { %s1237_s11 = scalar_select %p1129_p12, 1, 0 }
  0x33   : > { %p911_p6 = scmp.ne.s32.totalorder %s1136_s20, %s910_s6  ;;  %p916_p13 = scmp.lt.u32.totalorder %s1136_s20, %s1229_s2 }
  0x34   : > { %p917_p1 = scmp.lt.u32.totalorder %s915_s28, %s910_s6  ;;  %p919_p4 = scmp.lt.u32.totalorder %s910_s6, %s1136_s20 }
  0x35   : > { %p913_p7 = pnand %p911_p6, %p882_p0 }
  0x36   : > { %p918_p3 = por %p917_p1, %p916_p13 }
  0x37   : > { %p914_p10 = pneg %p913_p7 }
  0x38   : > { %p920_p5 = por %p919_p4, %p918_p3 }
  0x3a   : > { %p921_p2 = pnand %p920_p5, %p914_p10 }
  0x3c   : > { %924 = shalt.err (!%p921_p2)
}
  0x3d   : > { %s925_s26 = scalar_lea.vmem %s215_s22, 32  ;;  %s1000_s5 = smov [#allocation5]  }
  0x3e   : > { %p926_p9 = scmp.ne.s32.totalorder %s215_s22, %s925_s26  ;;  %s930_s9 = sshll.u32 %s1000_s5, 4  ;;  %s931_s9 = int_to_ptr.vmem [resolvable:$false] %s930_s9 }
  0x3f   : > { %s932_s10 = scalar_lea.vmem %s931_s9, 64  ;;  %p933_p8 = scmp.lt.s32.totalorder %s215_s22, %s931_s9 }
  0x40   : > { %p928_p6 = pnand %p926_p9, %p882_p0  ;;  %p934_p12 = scmp.lt.s32.totalorder %s932_s10, %s925_s26 }
  0x42   : > { %p929_p7 = pneg %p928_p6  ;;  %p935_p1 = por %p934_p12, %p933_p8 }
  0x44   : > { %p936_p13 = pnand %p935_p1, %p929_p7 }
  0x46   : > { %939 = shalt.err (!%p936_p13)
}
  0x47   : > { %800 = dma.hbm_to_vmem [thread:$0]  (!%p1089_p11), %s1136_s20, 32, %s215_s22, %s203_s4  }
  0x48   : > { %p1238_p10 = scmp.ne.s32.totalorder %s1237_s11, 0 }
  0x49   : > { %s1161_s12 = sand.u32 (!%p1238_p10), 1, %s978_s13   ;;  %p1239_p8 = scmp.ne.s32.totalorder (!%p1238_p10), %s1233_s23, 0 }
  0x4a   : > { %223 = sbr.rel (%p1238_p10) target bundleno = 347 (0x15b), region = 32  ;;  %s737_s18 = sshll.u32 (!%p1238_p10), %s1161_s12, 7 }
  0x4b   : > { %s226_s21 = scalar_lea.sflag (!%p1238_p10), [#allocation4], %s1161_s12  ;;  %s1165_s6 = scalar_lea.vmem (!%p1238_p10), [#allocation3], %s737_s18 }
  0x51   : > { %965 = dma.done.wait (%p1239_p8), %s226_s21, 2048  }
  0x52   : > { %967 = vsyncadd (%p1239_p8), %s226_s21, 4294965248  ;;  %s738_s7 = sshll.u32 %s1161_s12, 1  ;;  %s235_s11 = scalar_lea.sflag [#allocation6], %s1161_s12 }
  0x53   : > { %s1173_s20 = scalar_lea.vmem [#allocation5], %s738_s7 }
  0x54   : > { %969 = dma.done.wait (%p1239_p8), %s235_s11, 32  }
  0x55   : > { %971 = vsyncadd (%p1239_p8), %s235_s11, 4294967264  ;;  %v1001_v0 = vmov 0   ;;  %v854_v1 = vld [vmem:[%s1165_s6 + $0x4] ss:$8 sps:$4 sm:$0xff]   ;;  %v856_v2 = vld [vmem:[%s1165_s6] ss:$8 sps:$4 sm:$0xff]   ;;  %v502_v19 = vlaneseq }
  0x56   : > { %452 = vmatprep.mubr.bf16.mxu0 %v1001_v0  ;;  %462 = vmatprep.mubr.bf16.mxu1 %v1001_v0  ;;  %v857_v3 = vld [vmem:[%s1165_s6 + $0x14] ss:$8 sps:$4 sm:$0xff]   ;;  %v859_v4 = vld [vmem:[%s1165_s6 + $0x10] ss:$8 sps:$4 sm:$0xff]   ;;  %v860_v5 = vld [vmem:[%s1165_s6 + $0x24] ss:$8 sps:$4 sm:$0xff]  }
  0x57   : > { %420 = vmatprep.subr.bf16.mxu0 %v854_v1  ;;  %774 = vmatprep.subr.bf16.mxu1 %v854_v1  ;;  %v862_v6 = vld [vmem:[%s1165_s6 + $0x20] ss:$8 sps:$4 sm:$0xff]   ;;  %v863_v7 = vld [vmem:[%s1165_s6 + $0x34] ss:$8 sps:$4 sm:$0xff]   ;;  %v865_v8 = vld [vmem:[%s1165_s6 + $0x30] ss:$8 sps:$4 sm:$0xff]  }
  0x58   : > { %421 = vmatpush1.bf16.msra.mxu0 %v856_v2  ;;  %782 = vmatpush1.bf16.msra.mxu1 %v856_v2  ;;  %v866_v9 = vld [vmem:[%s1165_s6 + $0x44] ss:$8 sps:$4 sm:$0xff]   ;;  %v868_v10 = vld [vmem:[%s1165_s6 + $0x40] ss:$8 sps:$4 sm:$0xff]   ;;  %v869_v11 = vld [vmem:[%s1165_s6 + $0x54] ss:$8 sps:$4 sm:$0xff]  }
  0x59   : > { %422 = vmatprep.subr.bf16.mxu0 %v857_v3  ;;  %775 = vmatprep.subr.bf16.mxu1 %v857_v3  ;;  %v871_v12 = vld [vmem:[%s1165_s6 + $0x50] ss:$8 sps:$4 sm:$0xff]   ;;  %v872_v13 = vld [vmem:[%s1165_s6 + $0x64] ss:$8 sps:$4 sm:$0xff]   ;;  %v874_v14 = vld [vmem:[%s1165_s6 + $0x60] ss:$8 sps:$4 sm:$0xff]  }
  0x5a   : > { %v875_v15 = vld [vmem:[%s1165_s6 + $0x74] ss:$8 sps:$4 sm:$0xff]   ;;  %v877_v16 = vld [vmem:[%s1165_s6 + $0x70] ss:$8 sps:$4 sm:$0xff]   ;;  %v878_v17 = vld [vmem:[%s1227_s0] sm:$0xff]   ;;  %v503_v20 = vshrl.u32 %v502_v19, 7 }
  0x5b   : > { %v879_v18 = vld [vmem:[%s1227_s0 + $0x8] sm:$0xff]   ;;  %v500_v22 = vld [vmem:[%s1173_s20] sm:$0x3]  ;;  %s739_s27 = sshll.u32 %s1161_s12, 5  ;;  %p1240_p11 = scmp.ne.s32.totalorder %s1234_s25, 0 }
  0x5c   : > { %423 = vmatpush1.bf16.msra.mxu0 %v859_v4  ;;  %783 = vmatpush1.bf16.msra.mxu1 %v859_v4  ;;  %v504_v21 = vsub.s32 0, %v503_v20  ;;  %v508_v23 = vsub.s32 1, %v503_v20  ;;  %s272_s28 = scalar_lea.vmem [#allocation7], %s739_s27  ;;  %s773_s29 = sshll.u32 (%p1240_p11), %s986_s15, 3 }
  0x5d   : > { %424 = vmatprep.subr.bf16.mxu0 %v860_v5  ;;  %776 = vmatprep.subr.bf16.mxu1 %v860_v5  ;;  %s560_s5 = scalar_lea.vmem (%p1240_p11), %s1230_s3, %s773_s29 }
  0x5e   : > { %v505_v24 = vrot.slane %v500_v22, %v504_v21  ;;  %v509_v25 = vrot.slane %v500_v22, %v508_v23 }
  0x60   : > { %425 = vmatpush1.bf16.msra.mxu0 %v862_v6  ;;  %784 = vmatpush1.bf16.msra.mxu1 %v862_v6 }
  0x61   : > { %426 = vmatprep.subr.bf16.mxu0 %v863_v7  ;;  %777 = vmatprep.subr.bf16.mxu1 %v863_v7 }
  0x64   : > { %427 = vmatpush1.bf16.msra.mxu0 %v865_v8  ;;  %785 = vmatpush1.bf16.msra.mxu1 %v865_v8 }
  0x65   : > { %428 = vmatprep.subr.bf16.mxu0 %v866_v9  ;;  %778 = vmatprep.subr.bf16.mxu1 %v866_v9 }
  0x68   : > { %429 = vmatpush1.bf16.msra.mxu0 %v868_v10  ;;  %786 = vmatpush1.bf16.msra.mxu1 %v868_v10 }
  0x69   : > { %430 = vmatprep.subr.bf16.mxu0 %v869_v11  ;;  %779 = vmatprep.subr.bf16.mxu1 %v869_v11 }
  0x6c   : > { %431 = vmatpush1.bf16.msra.mxu0 %v871_v12  ;;  %787 = vmatpush1.bf16.msra.mxu1 %v871_v12 }
  0x6d   : > { %432 = vmatprep.subr.bf16.mxu0 %v872_v13  ;;  %780 = vmatprep.subr.bf16.mxu1 %v872_v13 }
  0x70   : > { %433 = vmatpush1.bf16.msra.mxu0 %v874_v14  ;;  %788 = vmatpush1.bf16.msra.mxu1 %v874_v14 }
  0x71   : > { %434 = vmatprep.subr.bf16.mxu0 %v875_v15  ;;  %781 = vmatprep.subr.bf16.mxu1 %v875_v15 }
  0x74   : > { %435 = vmatpush1.bf16.msra.mxu0 %v877_v16  ;;  %789 = vmatpush1.bf16.msra.mxu1 %v877_v16 }
  0x77   : > { %453 = vmatmul.mubr.bf16.vlgmr.msra.gmra.mrb[0].mxu0 %v878_v17  ;;  %463 = vmatmul.mubr.bf16.vlgmr.msra.gmra.mrb[0].mxu1 %v879_v18 }
 0x14a   : > { %v454_v26 = vpop.f32.mrb[0].mxu0  ;;  %v464_v27 = vpop.f32.mrb[0].mxu1 }
 0x14b   : > { %v512_v28 = vadd.f32 %v505_v24, %v454_v26  ;;  %v516_v29 = vadd.f32 %v505_v24, %v464_v27  ;;  %v456_v30 = vpop.f32.mrb[1].mxu0  ;;  %v466_v31 = vpop.f32.mrb[1].mxu1 }
 0x14c   : > { %v513_v32 = vadd.f32 %v509_v25, %v456_v30  ;;  %v517_v33 = vadd.f32 %v509_v25, %v466_v31  ;;  %v458_v34 = vpop.f32.mrb[2].mxu0  ;;  %v468_v35 = vpop.f32.mrb[2].mxu1  ;;  %554 = sbr.rel (!%p1240_p11) target bundleno = 347 (0x15b), region = 52 }
 0x14d   : > { %v514_v36 = vadd.f32 %v505_v24, %v458_v34  ;;  %v518_v37 = vadd.f32 %v505_v24, %v468_v35  ;;  %v460_v38 = vpop.f32.mrb[3].mxu0  ;;  %v470_v39 = vpop.f32.mrb[3].mxu1 }
 0x14e   : > { %v769_v40 = vpack.c.bf16 %v513_v32, %v512_v28  ;;  %v771_v41 = vpack.c.bf16 %v517_v33, %v516_v29  ;;  %v515_v42 = vadd.f32 %v509_v25, %v460_v38  ;;  %v519_v43 = vadd.f32 %v509_v25, %v470_v39 }
 0x150   : > { %544 = vst [vmem:[%s272_s28] sm:$0xff] %v769_v40  ;;  %546 = vst [vmem:[%s272_s28 + $0x10] sm:$0xff] %v771_v41  ;;  %v770_v44 = vpack.c.bf16 %v515_v42, %v514_v36  ;;  %v772_v45 = vpack.c.bf16 %v519_v43, %v518_v37 }
 0x152   : > { %545 = vst [vmem:[%s272_s28 + $0x8] sm:$0xff] %v770_v44  ;;  %547 = vst [vmem:[%s272_s28 + $0x18] sm:$0xff] %v772_v45 }
 0x157   : > { %v594_v46 = vld [vmem:[%s272_s28] sm:$0xff]  ;;  %v598_v48 = vld [vmem:[%s272_s28 + $0x10] sm:$0xff] }
 0x158   : > { %595 = vst [vmem:[%s560_s5] sm:$0xff] %v594_v46  ;;  %599 = vst [vmem:[%s560_s5 + $0x80] sm:$0xff] %v598_v48 }
 0x159   : > { %v596_v47 = vld [vmem:[%s272_s28 + $0x8] sm:$0xff]  ;;  %v600_v49 = vld [vmem:[%s272_s28 + $0x18] sm:$0xff] }
 0x15a   : > { %597 = vst [vmem:[%s560_s5 + $0x40] sm:$0xff] %v596_v47  ;;  %601 = vst [vmem:[%s560_s5 + $0xc0] sm:$0xff] %v600_v49 }
 0x15b PF: > { %s19_s17 = sadd.s32 1, %s994_s17   ;;  %s1241_s12 = smov %s978_s13 }
 0x15c   : > { %p16_p0 = scmp.ge.s32.totalorder %s19_s17, 10   ;;  %s1242_s13 = smov %s982_s14 }
 0x15d   : > { %s1243_s14 = smov %s1070_s24  ;;  %s1244_s15 = smov %s990_s16 }
 0x15e   : > { %s1245_s16 = smov %s1247_s19  ;;  %18 = sbr.rel (!%p16_p0) target bundleno = 6 (0x6), region = 134 }
 0x165   :  { %617 = vsyncpa [#allocation4], 1 }
 0x166   :  { %619 = vsyncpa [#allocation4 + $0x1], 1 }
 0x167   :  { %620 = vsyncpa [#allocation6], 1 }
 0x168   :  { %622 = vsyncpa [#allocation6 + $0x1], 1 }

// kernel: rm1_forward.8
= control target key start
LH: loop header
LB: loop body
LE: loop exit
PB: predicated region body
PF: predicated region fallthrough
CT: control target
= control target key end

     0   :  { %v524_v1 = vmov 0   ;;  %v391_v35 = vlaneseq  ;;  %s690_s1 = inlined_call_operand.vmem [shape: bf16[128,512], index: 1, kind: input, shape index: {}]   ;;  %s691_s0 = inlined_call_operand.vmem [shape: bf16[24,128], index: 0, kind: input, shape index: {}]   ;;  %s692_s2 = inlined_call_operand.vmem [shape: f32[1,512], index: 2, kind: input, shape index: {}]   ;;  %s693_s3 = inlined_call_operand.vmem [shape: f32[24,512], index: 3, kind: output, shape index: {}]  }
   0x1   :  { %v474_v0 = vld [vmem:[%s690_s1 + $0x4] ss:$16 sps:$4 sm:$0xff]   ;;  %280 = vmatprep.mubr.bf16.mxu0 %v524_v1  ;;  %331 = vmatprep.mubr.bf16.mxu1 %v524_v1  ;;  %v476_v2 = vld [vmem:[%s690_s1 + $0xc] ss:$16 sps:$4 sm:$0xff]   ;;  %v478_v3 = vld [vmem:[%s690_s1] ss:$16 sps:$4 sm:$0xff]  }
   0x2   :  { %248 = vmatprep.subr.bf16.mxu0 %v474_v0  ;;  %v479_v4 = vld [vmem:[%s690_s1 + $0x8] ss:$16 sps:$4 sm:$0xff]   ;;  %299 = vmatprep.subr.bf16.mxu1 %v476_v2  ;;  %v480_v5 = vld [vmem:[%s690_s1 + $0x24] ss:$16 sps:$4 sm:$0xff]   ;;  %v482_v6 = vld [vmem:[%s690_s1 + $0x2c] ss:$16 sps:$4 sm:$0xff]  }
   0x3   :  { %249 = vmatpush1.bf16.msra.mxu0 %v478_v3  ;;  %300 = vmatpush1.bf16.msra.mxu1 %v479_v4  ;;  %v484_v7 = vld [vmem:[%s690_s1 + $0x20] ss:$16 sps:$4 sm:$0xff]   ;;  %v485_v8 = vld [vmem:[%s690_s1 + $0x28] ss:$16 sps:$4 sm:$0xff]   ;;  %v486_v9 = vld [vmem:[%s690_s1 + $0x44] ss:$16 sps:$4 sm:$0xff]  }
   0x4   :  { %250 = vmatprep.subr.bf16.mxu0 %v480_v5  ;;  %301 = vmatprep.subr.bf16.mxu1 %v482_v6  ;;  %v488_v10 = vld [vmem:[%s690_s1 + $0x4c] ss:$16 sps:$4 sm:$0xff]   ;;  %v490_v11 = vld [vmem:[%s690_s1 + $0x40] ss:$16 sps:$4 sm:$0xff]   ;;  %v491_v12 = vld [vmem:[%s690_s1 + $0x48] ss:$16 sps:$4 sm:$0xff]  }
   0x5   :  { %v492_v13 = vld [vmem:[%s690_s1 + $0x64] ss:$16 sps:$4 sm:$0xff]   ;;  %v494_v14 = vld [vmem:[%s690_s1 + $0x6c] ss:$16 sps:$4 sm:$0xff]   ;;  %v496_v15 = vld [vmem:[%s690_s1 + $0x60] ss:$16 sps:$4 sm:$0xff]  }
   0x6   :  { %v497_v16 = vld [vmem:[%s690_s1 + $0x68] ss:$16 sps:$4 sm:$0xff]   ;;  %v498_v17 = vld [vmem:[%s690_s1 + $0x84] ss:$16 sps:$4 sm:$0xff]   ;;  %v500_v18 = vld [vmem:[%s690_s1 + $0x8c] ss:$16 sps:$4 sm:$0xff]  }
   0x7   :  { %251 = vmatpush1.bf16.msra.mxu0 %v484_v7  ;;  %302 = vmatpush1.bf16.msra.mxu1 %v485_v8  ;;  %v502_v19 = vld [vmem:[%s690_s1 + $0x80] ss:$16 sps:$4 sm:$0xff]   ;;  %v503_v20 = vld [vmem:[%s690_s1 + $0x88] ss:$16 sps:$4 sm:$0xff]   ;;  %v504_v21 = vld [vmem:[%s690_s1 + $0xa4] ss:$16 sps:$4 sm:$0xff]  }
   0x8   :  { %252 = vmatprep.subr.bf16.mxu0 %v486_v9  ;;  %303 = vmatprep.subr.bf16.mxu1 %v488_v10  ;;  %v506_v22 = vld [vmem:[%s690_s1 + $0xac] ss:$16 sps:$4 sm:$0xff]   ;;  %v508_v23 = vld [vmem:[%s690_s1 + $0xa0] ss:$16 sps:$4 sm:$0xff]   ;;  %v509_v24 = vld [vmem:[%s690_s1 + $0xa8] ss:$16 sps:$4 sm:$0xff]  }
   0x9   :  { %v510_v25 = vld [vmem:[%s690_s1 + $0xc4] ss:$16 sps:$4 sm:$0xff]   ;;  %v512_v26 = vld [vmem:[%s690_s1 + $0xcc] ss:$16 sps:$4 sm:$0xff]   ;;  %v514_v27 = vld [vmem:[%s690_s1 + $0xc0] ss:$16 sps:$4 sm:$0xff]  }
   0xa   :  { %v515_v28 = vld [vmem:[%s690_s1 + $0xc8] ss:$16 sps:$4 sm:$0xff]   ;;  %v516_v29 = vld [vmem:[%s690_s1 + $0xe4] ss:$16 sps:$4 sm:$0xff]   ;;  %v518_v30 = vld [vmem:[%s690_s1 + $0xec] ss:$16 sps:$4 sm:$0xff]  }
   0xb   :  { %253 = vmatpush1.bf16.msra.mxu0 %v490_v11  ;;  %304 = vmatpush1.bf16.msra.mxu1 %v491_v12  ;;  %v520_v31 = vld [vmem:[%s690_s1 + $0xe0] ss:$16 sps:$4 sm:$0xff]   ;;  %v521_v32 = vld [vmem:[%s690_s1 + $0xe8] ss:$16 sps:$4 sm:$0xff]   ;;  %v392_v36 = vshrl.u32 %v391_v35, 7 }
   0xc   :  { %254 = vmatprep.subr.bf16.mxu0 %v492_v13  ;;  %305 = vmatprep.subr.bf16.mxu1 %v494_v14  ;;  %v522_v33 = vld [vmem:[%s691_s0] sm:$0xff]   ;;  %v523_v34 = vld [vmem:[%s691_s0 + $0x8] ss:$0 sps:$4 sm:$0xff]  }
   0xd   :  { %v393_v37 = vsub.s32 0, %v392_v36  ;;  %v401_v38 = vsub.s32 2, %v392_v36  ;;  %v389_v39 = vld [vmem:[%s692_s2] sm:$0xf]  ;;  %v397_v40 = vsub.s32 1, %v392_v36  ;;  %v405_v41 = vsub.s32 3, %v392_v36 }
   0xf   :  { %255 = vmatpush1.bf16.msra.mxu0 %v496_v15  ;;  %306 = vmatpush1.bf16.msra.mxu1 %v497_v16  ;;  %v394_v42 = vrot.slane %v389_v39, %v393_v37  ;;  %v402_v43 = vrot.slane %v389_v39, %v401_v38  ;;  %v398_v44 = vrot.slane %v389_v39, %v397_v40 }
  0x10   :  { %256 = vmatprep.subr.bf16.mxu0 %v498_v17  ;;  %307 = vmatprep.subr.bf16.mxu1 %v500_v18  ;;  %v406_v45 = vrot.slane %v389_v39, %v405_v41 }
  0x13   :  { %257 = vmatpush1.bf16.msra.mxu0 %v502_v19  ;;  %308 = vmatpush1.bf16.msra.mxu1 %v503_v20 }
  0x14   :  { %258 = vmatprep.subr.bf16.mxu0 %v504_v21  ;;  %309 = vmatprep.subr.bf16.mxu1 %v506_v22 }
  0x17   :  { %259 = vmatpush1.bf16.msra.mxu0 %v508_v23  ;;  %310 = vmatpush1.bf16.msra.mxu1 %v509_v24 }
  0x18   :  { %260 = vmatprep.subr.bf16.mxu0 %v510_v25  ;;  %311 = vmatprep.subr.bf16.mxu1 %v512_v26 }
  0x1b   :  { %261 = vmatpush1.bf16.msra.mxu0 %v514_v27  ;;  %312 = vmatpush1.bf16.msra.mxu1 %v515_v28 }
  0x1c   :  { %262 = vmatprep.subr.bf16.mxu0 %v516_v29  ;;  %313 = vmatprep.subr.bf16.mxu1 %v518_v30 }
  0x1f   :  { %263 = vmatpush1.bf16.msra.mxu0 %v520_v31  ;;  %314 = vmatpush1.bf16.msra.mxu1 %v521_v32 }
  0x22   :  { %281 = vmatmul.mubr.bf16.vlgmr.msra.gmra.mrb[0].mxu0 %v522_v33  ;;  %332 = vmatmul.mubr.bf16.vlgmr.msra.gmra.mrb[0].mxu1 %v522_v33 }
  0x23   :  { %290 = vmatprep.mubr.bf16.mxu0 %v524_v1  ;;  %341 = vmatprep.mubr.bf16.mxu1 %v524_v1 }
  0x2a   :  { %291 = vmatmul.mubr.bf16.gmra.mrb[4].mxu0 %v523_v34  ;;  %342 = vmatmul.mubr.bf16.gmra.mrb[4].mxu1 %v523_v34 }
  0xf5   :  { %v282_v46 = vpop.f32.mrb[0].mxu0  ;;  %v333_v47 = vpop.f32.mrb[0].mxu1 }
  0xf6   :  { %v411_v48 = vadd.f32 %v394_v42, %v282_v46  ;;  %v413_v49 = vadd.f32 %v402_v43, %v333_v47  ;;  %v284_v50 = vpop.f32.mrb[1].mxu0  ;;  %v335_v51 = vpop.f32.mrb[1].mxu1 }
  0xf7   :  { %v412_v52 = vadd.f32 %v398_v44, %v284_v50  ;;  %v414_v53 = vadd.f32 %v406_v45, %v335_v51  ;;  %v286_v54 = vpop.f32.mrb[2].mxu0  ;;  %v337_v55 = vpop.f32.mrb[2].mxu1 }
  0xf8   :  { %423 = vst [vmem:[%s693_s3] sm:$0xff] %v411_v48  ;;  %425 = vst [vmem:[%s693_s3 + $0x10] sm:$0xff] %v413_v49  ;;  %v415_v56 = vadd.f32 %v394_v42, %v286_v54  ;;  %v417_v57 = vadd.f32 %v402_v43, %v337_v55  ;;  %v288_v58 = vpop.f32.mrb[3].mxu0  ;;  %v339_v59 = vpop.f32.mrb[3].mxu1 }
  0xf9   :  { %424 = vst [vmem:[%s693_s3 + $0x8] sm:$0xff] %v412_v52  ;;  %426 = vst [vmem:[%s693_s3 + $0x18] sm:$0xff] %v414_v53  ;;  %v416_v60 = vadd.f32 %v398_v44, %v288_v58  ;;  %v418_v61 = vadd.f32 %v406_v45, %v339_v59 }
  0xfa   :  { %427 = vst [vmem:[%s693_s3 + $0x20] sm:$0xff] %v415_v56  ;;  %429 = vst [vmem:[%s693_s3 + $0x30] sm:$0xff] %v417_v57 }
  0xfb   :  { %428 = vst [vmem:[%s693_s3 + $0x28] sm:$0xff] %v416_v60  ;;  %430 = vst [vmem:[%s693_s3 + $0x38] sm:$0xff] %v418_v61 }
  0xfd   :  { %v292_v62 = vpop.f32.mrb[4].mxu0  ;;  %v343_v63 = vpop.f32.mrb[4].mxu1 }
  0xfe   :  { %v419_v0 = vadd.f32 %v394_v42, %v292_v62  ;;  %v421_v1 = vadd.f32 %v402_v43, %v343_v63  ;;  %v294_v2 = vpop.f32.mrb[5].mxu0  ;;  %v345_v3 = vpop.f32.mrb[5].mxu1 }
  0xff   :  { %v420_v4 = vadd.f32 %v398_v44, %v294_v2  ;;  %v422_v5 = vadd.f32 %v406_v45, %v345_v3  ;;  %v296_v6 = vpop.f32.mrb[6].mxu0  ;;  %v347_v7 = vpop.f32.mrb[6].mxu1 }
 0x100   :  { %431 = vst [vmem:[%s693_s3 + $0x40] sm:$0xff] %v419_v0  ;;  %433 = vst [vmem:[%s693_s3 + $0x50] sm:$0xff] %v421_v1  ;;  %v297_v8 = vpop.f32.mrb[7].mxu0  ;;  %v348_v9 = vpop.f32.mrb[7].mxu1 }
 0x101   :  { %432 = vst [vmem:[%s693_s3 + $0x48] sm:$0xff] %v420_v4  ;;  %434 = vst [vmem:[%s693_s3 + $0x58] sm:$0xff] %v422_v5 }

// kernel: rm1_forward.9
= control target key start
LH: loop header
LB: loop body
LE: loop exit
PB: predicated region body
PF: predicated region fallthrough
CT: control target
= control target key end

     0   :  { %12 = vsyncpa [#allocation6], 0  ;;  %s1232_s0 = inlined_call_operand.vmem [shape: bf16[2,2,16,16], index: 0, kind: input, shape index: {}]   ;;  %s1233_s1 = inlined_call_operand.vmem [shape: f32[2,2,16,16], index: 1, kind: input, shape index: {}]   ;;  %s1234_s2 = inlined_call_operand.vmem [shape: f32[1,16], index: 2, kind: input, shape index: {}]   ;;  %s1235_s3 = inlined_call_operand.vmem [shape: bf16[32,32], index: 3, kind: input, shape index: {}]   ;;  %s1236_s4 = inlined_call_operand.vmem [shape: bf16[32,32], index: 4, kind: input, shape index: {}]   ;;  %s1237_s5 = inlined_call_operand.vmem [shape: bf16[32,32], index: 5, kind: input, shape index: {}]   ;;  %s1238_s6 = inlined_call_operand.vmem [shape: bf16[32,32], index: 6, kind: input, shape index: {}]   ;;  %s1239_s7 = inlined_call_operand.hbm [shape: f32[2,16,16], index: 7, kind: output, shape index: {}]  }
   0x1   :  { %14 = vsyncpa [#allocation6 + $0x1], 0  ;;  %s1064_s24 = smov 0   ;;  %s1066_s25 = smov 0  }
   0x2   :  { %s1068_s26 = smov 0   ;;  %s1070_s27 = smov 0  }
   0x3 LB: > { %s1085_s28 = sadd.s32 4294967295, %s1015_s27   ;;  %s809_s29 = sadd.s32 4294967294, %s1015_s27   ;;  %s1015_s27 = sphi %s1070_s27, %s1247_s27   ;;  %s1011_s26 = sphi %s1068_s26, %s1246_s26   ;;  %s1007_s25 = sphi %s1066_s25, %s1245_s25   ;;  %s1003_s24 = sphi %s1064_s24, %s1244_s24  }
   0x4   : > { %s1089_s30 = sadd.s32 1, %s1015_s27   ;;  %s27_s8 = sadd.s32 1, %s1011_s26 }
   0x5   : > { %s24_s9 = ssub.s32 %s1015_s27, %s1089_s30  ;;  %p34_p0 = scmp.ne.s32.totalorder %s1011_s26, %s1007_s25 }
   0x6   : > { %p25_p1 = scmp.eq.s32.totalorder %s24_s9, 0  ;;  %p35_p2 = scmp.eq.s32.totalorder %s1015_s27, 0 }
   0x7   : > { %p195_p3 = scmp.eq.s32.totalorder %s1085_s28, 1  ;;  %p200_p4 = scmp.ne.s32.totalorder %s1007_s25, %s1003_s24 }
   0x8   : > { %s1101_s10 = scalar_select %p25_p1, %s1011_s26, %s27_s8  }
   0x9   : > { %p36_p5 = por %p35_p2, %p34_p0  ;;  %p1103_p6 = por %p195_p3, %p34_p0 }
   0xa   : > { %p201_p7 = scmp.eq.s32.totalorder %s809_s29, 1  ;;  %p811_p9 = scmp.ge.s32.totalorder %s1015_s27, 2 }
   0xc   : > { %p1107_p8 = por %p201_p7, %p200_p4  ;;  %232 = sbr.rel (%p811_p9) target bundleno = 26 (0x1a), region = 36 }
  0x13   : > { %235 = sbr.rel (!%p36_p5) target bundleno = 26 (0x1a), region = 40  ;;  %s237_s13 = sand.u32 (%p36_p5), 1, %s1011_s26  }
  0x14   : > { %s845_s14 = sshll.u32 (%p36_p5), %s1015_s27, 3  ;;  %s812_s15 = sshll.u32 (%p36_p5), %s237_s13, 4 }
  0x15   : > { %s242_s18 = scalar_lea.vmem (%p36_p5), %s1232_s0, %s845_s14  ;;  %s239_s19 = scalar_lea.vmem (%p36_p5), [#allocation4], %s812_s15 }
  0x16   : > { %v258_v0 = vld [vmem:[%s242_s18] sm:$0xff] (%p36_p5)   ;;  %v262_v1 = vld [vmem:[%s242_s18 + $0x10] sm:$0xff] (%p36_p5)  }
  0x17   : > { %259 = vst [vmem:[%s239_s19] sm:$0xff] (%p36_p5), %v258_v0   ;;  %263 = vst [vmem:[%s239_s19 + $0x8] sm:$0xff] (%p36_p5), %v262_v1  }
  0x1a PF: > { %p815_p10 = scmp.ge.s32.totalorder %s1015_s27, 1  ;;  %p303_p11 = scmp.lt.s32.totalorder %s1015_s27, 3 }
  0x1c   : > { %p304_p12 = pnand %p815_p10, %p303_p11 }
  0x1d   : > { %s1240_s20 = sand.u32 (!%p304_p12), 1, %s1007_s25   ;;  %v941_v2 = vld [vmem:[%s1235_s3] sm:$0xff] (!%p304_p12)   ;;  %v1017_v3 = vmov (!%p304_p12), 0.0   ;;  %vm360_vm0 = vcmask (!%p304_p12), 130048   ;;  %s1018_s8 = smov (!%p304_p12), 16   ;;  %v942_v6 = vld [vmem:[%s1235_s3 + $0x8] sm:$0xff] (!%p304_p12)   ;;  %v519_v19 = vlaneseq (!%p304_p12) }
  0x1e   : > { %307 = sbr.rel (%p304_p12) target bundleno = 1434 (0x59a), region = 85  ;;  %s1127_s23 = sshll.u32 (!%p304_p12), %s1240_s20, 4  ;;  %862 = vmatprep.subr.bf16.mxu0 (!%p304_p12), %v1017_v3  ;;  %vm1019_vm1 = vmmov (!%p304_p12), 0   ;;  %vm373_vm2 = vcmask (!%p304_p12), 261248   ;;  %vm392_vm3 = vcmask (!%p304_p12), 261120   ;;  %v943_v11 = vld [vmem:[%s1236_s4] sm:$0xff] (!%p304_p12)  }
  0x1f   : > { %863 = vmatpush3.bf16.msra.mxu0 (!%p304_p12), %v941_v2  ;;  %s312_s29 = scalar_lea.vmem (!%p304_p12), [#allocation4], %s1127_s23  ;;  %866 = vmatprep.mubr.msk.bf16.mxu0 (!%p304_p12), %vm1019_vm1, %v1017_v3  ;;  %s1020_s16 = smov (!%p304_p12), 112   ;;  %v944_v18 = vld [vmem:[%s1236_s4 + $0x8] sm:$0xff] (!%p304_p12)   ;;  %v520_v20 = vshrl.u32 (!%p304_p12), %v519_v19, 7  ;;  %v515_v21 = vld [vmem:[%s1234_s2] sm:$0x1] (!%p304_p12) }
  0x20   : > { %v939_v4 = vld [vmem:[%s312_s29 + $0x8] sm:$0xff] (!%p304_p12)   ;;  %864 = vmatprep.subr.bf16.mxu0 (!%p304_p12), %v1017_v3  ;;  %v940_v5 = vld [vmem:[%s312_s29] sm:$0xff] (!%p304_p12)   ;;  %874 = vmatprep.mubr.msk.bf16.mxu1 (!%p304_p12), %vm392_vm3, %v943_v11  ;;  %p346_p13 = scmp.lt.s32.totalorder (!%p304_p12), %s1085_s28, 1  ;;  %v526_v23 = vsub.f32 (!%p304_p12), 1.0, %v515_v21  ;;  %s1243_s13 = sand.u32 (!%p304_p12), 1, %s1007_s25  }
  0x21   : > { %370 = vrot.lane.b32.xlu0 (!%p304_p12), %v939_v4, %s1018_s8  ;;  %361 = vst.msk [vmem:[#allocation2] sm:$0xff] (!%p304_p12), %vm360_vm0, %v940_v5  ;;  %v521_v22 = vsub.s32 (!%p304_p12), 0, %v520_v20  ;;  %v945_v24 = vld [vmem:[%s1237_s5] sm:$0xff] (!%p304_p12)   ;;  %v946_v27 = vld [vmem:[%s1237_s5 + $0x8] sm:$0xff] (!%p304_p12)   ;;  %s1021_s17 = smov (!%p304_p12), [#allocation5]  }
  0x22   : > { %v947_v54 = vld [vmem:[%s1238_s6] sm:$0xff] (!%p304_p12)   ;;  %v948_v61 = vld [vmem:[%s1238_s6 + $0x8] sm:$0xff] (!%p304_p12)   ;;  %s957_s18 = sshll.u32 (!%p304_p12), %s1021_s17, 4  ;;  %s958_s18 = int_to_ptr.vmem [resolvable:$false] %s957_s18 }
  0x23   : > { %865 = vmatpush3.bf16.msra.mxu0 (!%p304_p12), %v942_v6  ;;  %v522_v25 = vrot.slane (!%p304_p12), %v515_v21, %v521_v22  ;;  %v531_v26 = vrot.slane (!%p304_p12), %v526_v23, %v521_v22  ;;  %s959_s20 = scalar_lea.vmem (!%p304_p12), %s958_s18, 512 }
  0x24   : > { %878 = vmatprep.subr.bf16.mxu0 (!%p304_p12), %v1017_v3 }
  0x25   : > { %s347_s19 = scalar_select %p346_p13, %s1085_s28, 1 }
  0x27   : > { %s846_s29 = sshll.u32 %s347_s19, 5 }
  0x28   : > { %s350_s14 = scalar_lea.vmem %s1233_s1, %s846_s29  ;;  %s847_s29 = sshll.u32 %s1085_s28, 8 }
  0x29   : > { %v831_v28 = vld [vmem:[%s350_s14 + $0x10] sm:$0xff]  ;;  %v832_v29 = vld [vmem:[%s350_s14 + $0x18] sm:$0xff]  ;;  %v516_v30 = vld [vmem:[%s350_s14] sm:$0xff]  ;;  %s1185_s28 = scalar_lea.hbm %s1239_s7, %s847_s29 }
  0x2a   : > { %v517_v31 = vld [vmem:[%s350_s14 + $0x8] sm:$0xff]  ;;  %v540_v33 = vmul.f32 %v831_v28, %v522_v25  ;;  %v541_v36 = vmul.f32 %v832_v29, %v522_v25  ;;  %v524_v37 = vmul.f32 %v522_v25, %v516_v30  ;;  %s1190_s14 = scalar_lea.sflag [#allocation6], %s1243_s13 }
  0x2b   : > { %v525_v40 = vmul.f32 %v522_v25, %v517_v31 }
  0x93   : > { %v371_v7 = vpop.permute.xlu0 %370 }
  0x94   : > { %374 = vst.msk [vmem:[#allocation2] sm:$0xff] %vm373_vm2, %v371_v7 }
  0x9b   : > { %v375_v8 = vld [vmem:[#allocation2] sm:$0xff] }
  0x9c   : > { %867 = vmatmul.mubr.msk.bf16.vlgmr.msra.gmra.mrb[0].mxu0 %vm392_vm3, %v375_v8 }
  0x9d   : > { %882 = vmatprep.mubr.msk.bf16.mxu0 %vm1019_vm1, %v1017_v3  ;;  %879 = vmatpush3.bf16.msra.mxu0 %v945_v24 }
  0x9e   : > { %880 = vmatprep.subr.bf16.mxu0 %v1017_v3 }
  0xa1   : > { %881 = vmatpush3.bf16.msra.mxu0 %v946_v27 }
 0x16f   : > { %v430_v9 = vpop.f32.mrb[0].mxu0 }
 0x170   : > { %v868_v10 = vpop.f32.mrb[1].mxu0 }
 0x171   : > { %v433_v12 = vpop.f32.mrb[2].mxu0 }
 0x172   : > { %v437_v13 = vpack.c.bf16 %v433_v12, %v430_v9  ;;  %v869_v14 = vpop.f32.mrb[3].mxu0 }
 0x174   : > { %438 = vst.msk [vmem:[#allocation3] sm:$0xff] %vm360_vm0, %v437_v13  ;;  %440 = vrot.lane.b32.xlu0 %v437_v13, %s1020_s16 }
 0x17b   : > { %v448_v15 = vld [vmem:[#allocation3] sm:$0xff] }
 0x17c   : > { %870 = vmatprep.subr.bf16.mxu1 %v448_v15 }
 0x17d   : > { %871 = vmatpush3.bf16.msra.mxu1 %v448_v15 }
 0x1e6   : > { %v441_v16 = vpop.permute.xlu0 %440 }
 0x1e7   : > { %443 = vst.msk [vmem:[#allocation3 + $0x8] sm:$0xff] %vm360_vm0, %v441_v16 }
 0x1ee   : > { %v449_v17 = vld [vmem:[#allocation3 + $0x8] sm:$0xff] }
 0x1ef   : > { %872 = vmatprep.subr.bf16.mxu1 %v449_v17 }
 0x1f0   : > { %873 = vmatpush3.bf16.msra.mxu1 %v449_v17 }
 0x1f3   : > { %875 = vmatmul.mubr.msk.bf16.vlgmr.msra.gmra.mrb[0].mxu1 %vm392_vm3, %v944_v18 }
 0x1f4   : > { %890 = vmatprep.mubr.msk.bf16.mxu1 %vm392_vm3, %v947_v54 }
 0x2c6   : > { %v876_v32 = vpop.f32.mrb[0].mxu1 }
 0x2c7   : > { %v542_v34 = vmul.f32 %v876_v32, %v531_v26  ;;  %v500_v35 = vpop.f32.mrb[1].mxu1 }
 0x2c8   : > { %v533_v38 = vmul.f32 %v531_v26, %v500_v35  ;;  %v877_v39 = vpop.f32.mrb[2].mxu1 }
 0x2c9   : > { %v543_v41 = vmul.f32 %v877_v39, %v531_v26  ;;  %v503_v42 = vpop.f32.mrb[3].mxu1  ;;  %v544_v44 = vadd.f32 %v542_v34, %v540_v33 }
 0x2ca   : > { %v534_v43 = vmul.f32 %v531_v26, %v503_v42  ;;  %v535_v46 = vadd.f32 %v533_v38, %v524_v37 }
 0x2cb   : > { %v545_v45 = vadd.f32 %v543_v41, %v541_v36 }
 0x2cc   : > { %v536_v47 = vadd.f32 %v534_v43, %v525_v40 }
 0x2cd   : > { %v548_v48 = vpack.c.bf16 %v545_v45, %v544_v44 }
 0x2ce   : > { %v546_v49 = vpack.c.bf16 %v536_v47, %v535_v46 }
 0x2cf   : > { %550 = vrot.lane.b32.xlu1 %v548_v48, %s1018_s8 }
 0x2d0   : > { %547 = vst.msk [vmem:[#allocation2] sm:$0xff] %vm360_vm0, %v546_v49 }
 0x341   : > { %v551_v50 = vpop.permute.xlu1 %550 }
 0x342   : > { %553 = vst.msk [vmem:[#allocation2] sm:$0xff] %vm373_vm2, %v551_v50 }
 0x349   : > { %v554_v51 = vld [vmem:[#allocation2] sm:$0xff] }
 0x34a   : > { %883 = vmatmul.mubr.msk.bf16.vlgmr.msra.gmra.mrb[4].mxu0 %vm392_vm3, %v554_v51 }
 0x41d   : > { %v608_v52 = vpop.f32.mrb[4].mxu0 }
 0x41e   : > { %v884_v53 = vpop.f32.mrb[5].mxu0 }
 0x41f   : > { %v611_v55 = vpop.f32.mrb[6].mxu0 }
 0x420   : > { %v615_v56 = vpack.c.bf16 %v611_v55, %v608_v52  ;;  %v885_v57 = vpop.f32.mrb[7].mxu0 }
 0x422   : > { %616 = vst.msk [vmem:[#allocation3] sm:$0xff] %vm360_vm0, %v615_v56  ;;  %618 = vrot.lane.b32.xlu1 %v615_v56, %s1020_s16  ;;  %s345_s16 = scalar_lea.vmem [#allocation5], %s1127_s23 }
 0x423   : > { %s729_s22 = sshll.u32 %s345_s16, 4  ;;  %s1179_s22 = int_to_ptr.vmem [resolvable:$true] %s729_s22 }
 0x424   : > { %s953_s15 = scalar_lea.vmem %s1179_s22, 256  ;;  %p960_p3 = scmp.lt.s32.totalorder %s1179_s22, %s958_s18 }
 0x425   : > { %p954_p0 = scmp.ne.s32.totalorder %s1179_s22, %s953_s15  ;;  %p961_p4 = scmp.lt.s32.totalorder %s959_s20, %s953_s15 }
 0x427   : > { %p955_p1 = pnand %p954_p0, %p1103_p6  ;;  %p962_p5 = por %p961_p4, %p960_p3 }
 0x429   : > { %v626_v58 = vld [vmem:[#allocation3] sm:$0xff]  ;;  %p956_p2 = pneg %p955_p1 }
 0x42a   : > { %886 = vmatprep.subr.bf16.mxu1 %v626_v58 }
 0x42b   : > { %887 = vmatpush3.bf16.msra.mxu1 %v626_v58  ;;  %p963_p7 = pnand %p962_p5, %p956_p2 }
 0x494   : > { %v619_v59 = vpop.permute.xlu1 %618 }
 0x495   : > { %621 = vst.msk [vmem:[#allocation3 + $0x8] sm:$0xff] %vm360_vm0, %v619_v59 }
 0x49c   : > { %v627_v60 = vld [vmem:[#allocation3 + $0x8] sm:$0xff] }
 0x49d   : > { %888 = vmatprep.subr.bf16.mxu1 %v627_v60 }
 0x49e   : > { %889 = vmatpush3.bf16.msra.mxu1 %v627_v60 }
 0x4a1   : > { %891 = vmatmul.mubr.msk.bf16.vlgmr.msra.gmra.mrb[4].mxu1 %vm392_vm3, %v948_v61 }
 0x574   : > { %v892_v62 = vpop.f32.mrb[4].mxu1 }
 0x575   : > { %v695_v63 = vmul.f32 %v892_v62, %v892_v62  ;;  %v678_v0 = vpop.f32.mrb[5].mxu1 }
 0x576   : > { %v693_v1 = vmul.f32 %v678_v0, %v678_v0  ;;  %v893_v2 = vpop.f32.mrb[6].mxu1 }
 0x577   : > { %v696_v3 = vmul.f32 %v893_v2, %v893_v2  ;;  %v681_v4 = vpop.f32.mrb[7].mxu1 }
 0x578   : > { %v697_v5 = vadd.f32 %v695_v63, %v693_v1  ;;  %v694_v6 = vmul.f32 %v681_v4, %v681_v4 }
 0x57a   : > { %949 = vrsqrt.f32 %v697_v5  ;;  %v698_v7 = vadd.f32 %v696_v3, %v694_v6  ;;  %vm701_vm4 = vcmp.eq.f32.partialorder %v697_v5, inf  ;;  %v704_v11 = vand.u32 2147483648, %v697_v5 }
 0x57b   : > { %vm703_vm5 = vcmp.eq.f32.partialorder %v697_v5, 0.0 }
 0x57c   : > { %951 = vrsqrt.f32 %v698_v7  ;;  %vm708_vm6 = vcmp.eq.f32.partialorder %v698_v7, inf  ;;  %v711_v15 = vand.u32 2147483648, %v698_v7  ;;  %vm710_vm7 = vcmp.eq.f32.partialorder %v698_v7, 0.0 }
 0x584   : > { %v950_v8 = vpop.eup %949 }
 0x585   : > { %v700_v9 = vmul.f32 %v950_v8, %v697_v5 }
 0x586   : > { %v952_v10 = vpop.eup %951 }
 0x587   : > { %v707_v12 = vmul.f32 %v952_v10, %v698_v7  ;;  %v702_v13 = vsel %vm701_vm4, %v697_v5, %v700_v9 }
 0x588   : > { %v705_v14 = vsel %vm703_vm5, %v704_v11, %v702_v13 }
 0x589   : > { %v709_v16 = vsel %vm708_vm6, %v698_v7, %v707_v12  ;;  %713 = vst.msk [vmem:[%s345_s16] sm:$0xff] %vm360_vm0, %v705_v14 }
 0x58a   : > { %v712_v17 = vsel %vm710_vm7, %v711_v15, %v709_v16 }
 0x58b   : > { %714 = vst.msk [vmem:[%s345_s16 + $0x8] sm:$0xff] %vm360_vm0, %v712_v17 }
 0x58c   : > { %966 = shalt.err (!%p963_p7)
}
 0x58d   : > { %s967_s19 = scalar_lea.hbm %s1185_s28, 256  ;;  %s971_s16 = scalar_lea.hbm %s1239_s7, 512 }
 0x58e   : > { %p968_p10 = scmp.ne.s32.totalorder %s1185_s28, %s967_s19  ;;  %p972_p13 = scmp.lt.u32.totalorder %s1185_s28, %s1239_s7 }
 0x58f   : > { %p973_p0 = scmp.lt.u32.totalorder %s971_s16, %s967_s19  ;;  %p975_p2 = scmp.lt.u32.totalorder %s967_s19, %s1185_s28 }
 0x590   : > { %p969_p11 = pnand %p968_p10, %p1103_p6 }
 0x591   : > { %p974_p1 = por %p973_p0, %p972_p13 }
 0x592   : > { %p970_p12 = pneg %p969_p11 }
 0x593   : > { %p976_p3 = por %p975_p2, %p974_p1 }
 0x595   : > { %p977_p4 = pnand %p976_p3, %p970_p12 }
 0x597   : > { %980 = shalt.err (!%p977_p4)
}
 0x598   : > { %s1022_s9 = smov 128   ;;  %s1023_s13 = smov 8  }
 0x599   : > { %894 = dma.vmem_to_hbm [thread:$0]  (%p1103_p6), %s1179_s22, 256, %s1185_s28, %s1190_s14, %s1022_s9, %s1022_s9, %s1023_s13  }
 0x59a PF: > { %s744_s15 = sand.u32 1, %s1003_s24   ;;  %p897_p5 = pnand %p811_p9, %p1107_p8 }
 0x59b   : > { %s745_s17 = scalar_lea.sflag [#allocation6], %s744_s15 }
 0x59c   : > { %998 = dma.done.wait (!%p897_p5), %s745_s17, 256  }
 0x59d   : > { %1000 = vsyncadd (!%p897_p5), %s745_s17, 4294967040  ;;  %p17_p7 = scmp.ge.s32.totalorder %s1089_s30, 4   ;;  %s1244_s24 = smov %s1007_s25 }
 0x59e   : > { %s1245_s25 = smov %s1011_s26  ;;  %s1246_s26 = smov %s1101_s10 }
 0x59f   : > { %s1247_s27 = smov %s1089_s30  ;;  %19 = sbr.rel (!%p17_p7) target bundleno = 3 (0x3), region = 134 }
 0x5a6   :  { %750 = vsyncpa [#allocation6], 1 }
 0x5a7   :  { %752 = vsyncpa [#allocation6 + $0x1], 1 }

</bundles_post_ra>
